<compile_context>
chip_gen: v7x
topology: tpu7x:2x2x1
jax: 0.10.0
libtpu: 0.0.40
codegen_flags: <defaults>
</compile_context>

<pallas_src>
import jax
import jax.numpy as jnp
from jax import lax
from jax.experimental import pallas as pl
from jax.experimental.pallas import tpu as pltpu


_VMEM_BLOCK_BUDGET = 40 * 1024 * 1024   # budget for blocks + scratch (fits v7x)
_VMEM_LIMIT_BYTES = 48 * 1024 * 1024    # scoped VMEM limit (< v7x 64 MiB physical)


def _round_up(n, m):
    return ((n + m - 1) // m) * m


def _pick_divisor_tile(n, candidates):
    for c in candidates:
        if c <= n and n % c == 0:
            return c
    return n


# ----------------------------------------------------------------------------
# Kernel 1: fused 1x1-conv QKV projection (x read once; bf16 MXU, f32 accum)
# ----------------------------------------------------------------------------
def _qkv_proj_kernel(x_ref, wq_ref, bq_ref, wk_ref, bk_ref, wv_ref, bv_ref,
                     q_ref, k_ref, v_ref):
    x = x_ref[...].astype(jnp.bfloat16)                          # (TM, C)
    q = jnp.dot(x, wq_ref[...], preferred_element_type=jnp.float32) + bq_ref[...]
    k = jnp.dot(x, wk_ref[...], preferred_element_type=jnp.float32) + bk_ref[...]
    v = jnp.dot(x, wv_ref[...], preferred_element_type=jnp.float32) + bv_ref[...]
    q_ref[...] = q.astype(q_ref.dtype)
    k_ref[...] = k.astype(k_ref.dtype)
    v_ref[...] = v.astype(v_ref.dtype)


def _proj_vmem_bytes(tm, c, cq):
    bf16, f32 = 2, 4
    return (2 * tm * c * f32                         # x input blocks (2x buffered)
            + 2 * (2 * c * cq + c * c) * bf16        # weight blocks
            + 2 * (2 * cq + c) * f32                 # bias blocks
            + 2 * (2 * tm * cq + tm * c) * bf16)     # q/k/v output blocks


def _proj_tile(r, c, cq, budget):
    for tm in (2048, 1024, 512, 256, 128):
        if tm <= r and r % tm == 0 and _proj_vmem_bytes(tm, c, cq) <= budget:
            return tm
    return 128 if r % 128 == 0 else r


def qkv_projection(x_flat, wq, bq, wk, bk, wv, bv, *, tm):
    R, C = x_flat.shape
    Cq = wq.shape[1]
    assert R % tm == 0
    return pl.pallas_call(
        _qkv_proj_kernel,
        out_shape=(
            jax.ShapeDtypeStruct((R, Cq), jnp.bfloat16),
            jax.ShapeDtypeStruct((R, Cq), jnp.bfloat16),
            jax.ShapeDtypeStruct((R, C), jnp.bfloat16),
        ),
        grid=(R // tm,),
        in_specs=[
            pl.BlockSpec((tm, C), lambda i: (i, 0)),
            pl.BlockSpec((C, Cq), lambda i: (0, 0)),
            pl.BlockSpec((1, Cq), lambda i: (0, 0)),
            pl.BlockSpec((C, Cq), lambda i: (0, 0)),
            pl.BlockSpec((1, Cq), lambda i: (0, 0)),
            pl.BlockSpec((C, C), lambda i: (0, 0)),
            pl.BlockSpec((1, C), lambda i: (0, 0)),
        ],
        out_specs=[
            pl.BlockSpec((tm, Cq), lambda i: (i, 0)),
            pl.BlockSpec((tm, Cq), lambda i: (i, 0)),
            pl.BlockSpec((tm, C), lambda i: (i, 0)),
        ],
        compiler_params=pltpu.CompilerParams(
            dimension_semantics=("parallel",),
            vmem_limit_bytes=_VMEM_LIMIT_BYTES),
    )(x_flat, wq, bq, wk, bk, wv, bv)


# ----------------------------------------------------------------------------
# Kernel 2: fused position attention (online softmax) + gamma residual
# ----------------------------------------------------------------------------
def _make_pam_attention_kernel(tk, hw_actual, hw_pad, kv_resident):
    def kernel(q_ref, k_ref, v_ref, x_ref, gamma_ref, o_ref, m_sc, l_sc, acc_sc):
        ki = pl.program_id(2)

        @pl.when(ki == 0)
        def _():
            m_sc[...] = jnp.full_like(m_sc, -jnp.inf)
            l_sc[...] = jnp.zeros_like(l_sc)
            acc_sc[...] = jnp.zeros_like(acc_sc)

        q = q_ref[...]                                           # (TQ, Cq) bf16
        if kv_resident:
            # K/V are batch-resident in VMEM: slice the current kv tile.
            start = pl.multiple_of(ki * tk, tk)
            k_t = k_ref[:, pl.ds(start, tk)]                     # (Cq, TK) bf16
            v = v_ref[pl.ds(start, tk), :]                       # (TK, C)  bf16
        else:
            k_t = k_ref[...]
            v = v_ref[...]

        # energy tile: plain (non-transposed) MXU matmul, lane-dense in keys.
        s = jnp.dot(q, k_t, preferred_element_type=jnp.float32)  # (TQ, TK) f32

        if hw_actual < hw_pad:  # static: only emitted when HW was padded
            key_idx = ki * tk + lax.broadcasted_iota(jnp.int32, (1, tk), 1)
            s = jnp.where(key_idx < hw_actual, s, -jnp.inf)

        # online softmax — elementwise math kept in f32 (v5e-safe).
        m_prev = m_sc[...]
        m_new = jnp.maximum(m_prev, jnp.max(s, axis=-1, keepdims=True))
        alpha = jnp.exp(m_prev - m_new)
        p = jnp.exp(s - m_new)                                   # (TQ, TK) f32
        l_sc[...] = alpha * l_sc[...] + jnp.sum(p, axis=-1, keepdims=True)
        acc_sc[...] = alpha * acc_sc[...] + jnp.dot(
            p.astype(jnp.bfloat16), v, preferred_element_type=jnp.float32)
        m_sc[...] = m_new

        @pl.when(ki == pl.num_programs(2) - 1)
        def _():
            # EUP reciprocal + gamma (from SMEM) folded into one (TQ,1) scale.
            scale = gamma_ref[0, 0] * pl.reciprocal(l_sc[...], approx=True)
            o_ref[...] = (acc_sc[...] * scale + x_ref[...]).astype(o_ref.dtype)

    return kernel


def _attn_vmem_bytes(hw_pad, c, cq, tq, tk, kv_resident):
    bf16, f32 = 2, 4
    kv_cols = hw_pad if kv_resident else tk
    return (2 * tq * cq * bf16            # q blocks (double-buffered)
            + 2 * cq * kv_cols * bf16     # kT blocks
            + 2 * kv_cols * c * bf16      # v blocks
            + 2 * tq * c * f32            # x residual blocks
            + 2 * tq * c * f32            # output blocks
            + (2 * tq + tq * c) * f32)    # m/l/acc scratch


def _attention_tiles(hw_pad, c, cq, budget):
    # Large TK amortizes the contraction-starved (K = Cq = C//8) QK^T pass;
    # keep the on-chip (tq, tk) score tile <= ~256 KiB to avoid vreg spill.
    tk = _pick_divisor_tile(hw_pad, (512, 256, 128))
    tq_cap = max(128, (64 * 1024) // tk)
    tq = _pick_divisor_tile(hw_pad, tuple(t for t in (256, 128) if t <= tq_cap))
    while _attn_vmem_bytes(hw_pad, c, cq, tq, tk, False) > budget and tk > 128:
        tk //= 2
    while _attn_vmem_bytes(hw_pad, c, cq, tq, tk, False) > budget and tq > 128:
        tq //= 2
    kv_resident = _attn_vmem_bytes(hw_pad, c, cq, tq, tk, True) <= budget
    return tq, tk, kv_resident


def pam_attention(q, k_t, v, x_seq, gamma, *, hw_actual):
    B, HW_pad, Cq = q.shape
    C = v.shape[-1]
    tq, tk, kv_resident = _attention_tiles(HW_pad, C, Cq, _VMEM_BLOCK_BUDGET)
    assert HW_pad % tq == 0 and HW_pad % tk == 0

    if kv_resident:
        k_spec = pl.BlockSpec((None, Cq, HW_pad), lambda b, qi, ki: (b, 0, 0))
        v_spec = pl.BlockSpec((None, HW_pad, C), lambda b, qi, ki: (b, 0, 0))
    else:
        k_spec = pl.BlockSpec((None, Cq, tk), lambda b, qi, ki: (b, 0, ki))
        v_spec = pl.BlockSpec((None, tk, C), lambda b, qi, ki: (b, ki, 0))

    kernel = _make_pam_attention_kernel(tk, hw_actual, HW_pad, kv_resident)

    return pl.pallas_call(
        kernel,
        out_shape=jax.ShapeDtypeStruct((B, HW_pad, C), jnp.float32),
        grid=(B, HW_pad // tq, HW_pad // tk),
        in_specs=[
            pl.BlockSpec((None, tq, Cq), lambda b, qi, ki: (b, qi, 0)),
            k_spec,
            v_spec,
            pl.BlockSpec((None, tq, C), lambda b, qi, ki: (b, qi, 0)),
            pl.BlockSpec(memory_space=pltpu.MemorySpace.SMEM),   # gamma scalar
        ],
        out_specs=pl.BlockSpec((None, tq, C), lambda b, qi, ki: (b, qi, 0)),
        scratch_shapes=[
            pltpu.VMEM((tq, 1), jnp.float32),   # running max
            pltpu.VMEM((tq, 1), jnp.float32),   # running denominator
            pltpu.VMEM((tq, C), jnp.float32),   # f32 output accumulator
        ],
        compiler_params=pltpu.CompilerParams(
            dimension_semantics=("parallel", "parallel", "arbitrary"),
            vmem_limit_bytes=_VMEM_LIMIT_BYTES),
    )(q, k_t, v, x_seq, gamma)


# ----------------------------------------------------------------------------
# PAM forward
# ----------------------------------------------------------------------------
def init_pam_params(key, in_dim):
    """Weights stored as (Cin, Cout). To load PyTorch Conv2d weights
    (Cout, Cin, 1, 1), use w_jax = w_torch.reshape(Cout, Cin).T."""
    cq = in_dim // 8
    kq, kk, kv = jax.random.split(key, 3)

    def conv_init(k, cin, cout):
        bound = 1.0 / (cin ** 0.5)   # PyTorch Conv2d default uniform init (k=1)
        kw, kb = jax.random.split(k)
        w = jax.random.uniform(kw, (cin, cout), jnp.float32, -bound, bound)
        b = jax.random.uniform(kb, (1, cout), jnp.float32, -bound, bound)
        return w, b

    wq, bq = conv_init(kq, in_dim, cq)
    wk, bk = conv_init(kk, in_dim, cq)
    wv, bv = conv_init(kv, in_dim, in_dim)
    gamma = jnp.zeros((1, 1), jnp.float32)   # matches PyTorch init (gamma = 0)
    return dict(wq=wq, bq=bq, wk=wk, bk=bk, wv=wv, bv=bv, gamma=gamma)


def pam_forward(params, x_nchw):
    B, C, H, W = x_nchw.shape
    Cq = params["wq"].shape[1]
    HW = H * W
    HW_pad = _round_up(HW, 128)

    # NCHW -> (B, HW, C) once at the boundary; pixel order h*W + w matches
    # torch .view(B, C, H*W).  Pad HW up to a multiple of 128 (padded keys are
    # masked in-kernel, padded queries dropped on writeback).
    x_seq = jnp.transpose(x_nchw, (0, 2, 3, 1)).reshape(B, HW, C)
    x_seq = x_seq.astype(jnp.float32)
    if HW_pad != HW:
        x_seq = jnp.pad(x_seq, ((0, 0), (0, HW_pad - HW), (0, 0)))
    x_flat = x_seq.reshape(B * HW_pad, C)

    # bf16 MXU operands: cast the conv weights once in the wrapper.
    wq = params["wq"].astype(jnp.bfloat16)
    wk = params["wk"].astype(jnp.bfloat16)
    wv = params["wv"].astype(jnp.bfloat16)

    tm = _proj_tile(B * HW_pad, C, Cq, _VMEM_BLOCK_BUDGET)
    q_flat, k_flat, v_flat = qkv_projection(
        x_flat, wq, params["bq"], wk, params["bk"], wv, params["bv"], tm=tm)

    q = q_flat.reshape(B, HW_pad, Cq)
    # Transpose K once in the wrapper so the attention kernel runs a plain
    # (non-transposed) MXU matmul with the key axis lane-dense.
    k_t = jnp.transpose(k_flat.reshape(B, HW_pad, Cq), (0, 2, 1))
    v = v_flat.reshape(B, HW_pad, C)

    out_seq = pam_attention(q, k_t, v, x_seq, params["gamma"], hw_actual=HW)
    out_seq = out_seq[:, :HW, :]
    return out_seq.reshape(B, H, W, C).transpose(0, 3, 1, 2)     # back to NCHW


def pam_reference(params, x_nchw):
    """Pure-JAX f32 reference for numerics."""
    B, C, H, W = x_nchw.shape
    HW = H * W
    xf = jnp.transpose(x_nchw, (0, 2, 3, 1)).reshape(B, HW, C).astype(jnp.float32)
    q = xf @ params["wq"] + params["bq"]
    k = xf @ params["wk"] + params["bk"]
    v = xf @ params["wv"] + params["bv"]
    energy = jnp.einsum("bic,bjc->bij", q, k)
    attn = jax.nn.softmax(energy, axis=-1)
    out = jnp.einsum("bij,bjc->bic", attn, v)
    out = params["gamma"][0, 0] * out + xf
    return out.reshape(B, H, W, C).transpose(0, 3, 1, 2)


if __name__ == "__main__":
    key = jax.random.PRNGKey(0)
    kp, kx1, kx2 = jax.random.split(key, 3)

    # in_dim must be >= 8 so that in_dim // 8 >= 1 (as in the PyTorch module).
    B, C = 2, 32
    params = init_pam_params(kp, C)
    # Use a nonzero gamma in the demo so the attention path is exercised
    # (PyTorch initializes gamma to 0, which would make out == x).
    params["gamma"] = jnp.full((1, 1), 0.5, jnp.float32)

    # Case 1: HW divisible by the tile sizes (16x16 -> HW = 256).
    x1 = jax.random.normal(kx1, (B, C, 16, 16), jnp.float32)
    out1 = jax.block_until_ready(pam_forward(params, x1))
    ref1 = pam_reference(params, x1)
    assert out1.shape == x1.shape, out1.shape
    assert bool(jnp.all(jnp.isfinite(out1)))
    assert bool(jnp.allclose(out1, ref1, atol=5e-2, rtol=5e-2))

    # Case 2: HW not divisible (12x12 -> HW = 144, padded to 256 + key mask).
    x2 = jax.random.normal(kx2, (B, C, 12, 12), jnp.float32)
    out2 = jax.block_until_ready(pam_forward(params, x2))
    ref2 = pam_reference(params, x2)
    assert out2.shape == x2.shape, out2.shape
    assert bool(jnp.all(jnp.isfinite(out2)))
    assert bool(jnp.allclose(out2, ref2, atol=5e-2, rtol=5e-2))

    print("KERNEL_OK")
</pallas_src>

<mosaic_0001>
module attributes {stable_mosaic.version = 11 : i64} {
  func.func @_qkv_proj_kernel(%arg0: i32, %arg1: memref<512x32xf32, #tpu.memory_space<vmem>>, %arg2: memref<32x4xbf16, #tpu.memory_space<vmem>>, %arg3: memref<1x4xf32, #tpu.memory_space<vmem>>, %arg4: memref<32x4xbf16, #tpu.memory_space<vmem>>, %arg5: memref<1x4xf32, #tpu.memory_space<vmem>>, %arg6: memref<32x32xbf16, #tpu.memory_space<vmem>>, %arg7: memref<1x32xf32, #tpu.memory_space<vmem>>, %arg8: memref<512x4xbf16, #tpu.memory_space<vmem>>, %arg9: memref<512x4xbf16, #tpu.memory_space<vmem>>, %arg10: memref<512x32xbf16, #tpu.memory_space<vmem>>) attributes {dimension_semantics = [#tpu.dimension_semantics<parallel>], iteration_bounds = array<i64: 1>, scalar_prefetch = 0 : i64, scratch_operands = 0 : i64, tpu.core_type = #tpu.core_type<tc>, window_params = [{transform_indices = @transform_0, window_bounds = array<i64: 512, 32>}, {pipeline_mode = #tpu.pipeline_mode<synchronous>, transform_indices = @transform_1, window_bounds = array<i64: 32, 4>}, {pipeline_mode = #tpu.pipeline_mode<synchronous>, transform_indices = @transform_2, window_bounds = array<i64: 1, 4>}, {pipeline_mode = #tpu.pipeline_mode<synchronous>, transform_indices = @transform_3, window_bounds = array<i64: 32, 4>}, {pipeline_mode = #tpu.pipeline_mode<synchronous>, transform_indices = @transform_4, window_bounds = array<i64: 1, 4>}, {pipeline_mode = #tpu.pipeline_mode<synchronous>, transform_indices = @transform_5, window_bounds = array<i64: 32, 32>}, {pipeline_mode = #tpu.pipeline_mode<synchronous>, transform_indices = @transform_6, window_bounds = array<i64: 1, 32>}, {transform_indices = @transform_7, window_bounds = array<i64: 512, 4>}, {transform_indices = @transform_8, window_bounds = array<i64: 512, 4>}, {transform_indices = @transform_9, window_bounds = array<i64: 512, 32>}]} {
    %c0 = arith.constant 0 : index
    %c0_0 = arith.constant 0 : index
    %0 = vector.load %arg1[%c0, %c0_0] : memref<512x32xf32, #tpu.memory_space<vmem>>, vector<512x32xf32>
    %1 = arith.truncf %0 : vector<512x32xf32> to vector<512x32xbf16>
    %c0_1 = arith.constant 0 : index
    %c0_2 = arith.constant 0 : index
    %2 = vector.load %arg2[%c0_1, %c0_2] : memref<32x4xbf16, #tpu.memory_space<vmem>>, vector<32x4xbf16>
    %cst = arith.constant dense<0.000000e+00> : vector<512x4xf32>
    %3 = tpu.matmul %1, %2, %cst {dimension_numbers = #tpu.dot_dimension_numbers<[1], [0], [0], [1], [0, 0, 1, 1], [], []>} : vector<512x32xbf16>, vector<32x4xbf16>, vector<512x4xf32> -> vector<512x4xf32>
    %c0_3 = arith.constant 0 : index
    %c0_4 = arith.constant 0 : index
    %4 = vector.load %arg3[%c0_3, %c0_4] : memref<1x4xf32, #tpu.memory_space<vmem>>, vector<1x4xf32>
    %5 = vector.broadcast %4 : vector<1x4xf32> to vector<512x4xf32>
    %6 = arith.addf %3, %5 : vector<512x4xf32>
    %c0_5 = arith.constant 0 : index
    %c0_6 = arith.constant 0 : index
    %7 = vector.load %arg4[%c0_5, %c0_6] : memref<32x4xbf16, #tpu.memory_space<vmem>>, vector<32x4xbf16>
    %cst_7 = arith.constant dense<0.000000e+00> : vector<512x4xf32>
    %8 = tpu.matmul %1, %7, %cst_7 {dimension_numbers = #tpu.dot_dimension_numbers<[1], [0], [0], [1], [0, 0, 1, 1], [], []>} : vector<512x32xbf16>, vector<32x4xbf16>, vector<512x4xf32> -> vector<512x4xf32>
    %c0_8 = arith.constant 0 : index
    %c0_9 = arith.constant 0 : index
    %9 = vector.load %arg5[%c0_8, %c0_9] : memref<1x4xf32, #tpu.memory_space<vmem>>, vector<1x4xf32>
    %10 = vector.broadcast %9 : vector<1x4xf32> to vector<512x4xf32>
    %11 = arith.addf %8, %10 : vector<512x4xf32>
    %c0_10 = arith.constant 0 : index
    %c0_11 = arith.constant 0 : index
    %12 = vector.load %arg6[%c0_10, %c0_11] : memref<32x32xbf16, #tpu.memory_space<vmem>>, vector<32x32xbf16>
    %cst_12 = arith.constant dense<0.000000e+00> : vector<512x32xf32>
    %13 = tpu.matmul %1, %12, %cst_12 {dimension_numbers = #tpu.dot_dimension_numbers<[1], [0], [0], [1], [0, 0, 1, 1], [], []>} : vector<512x32xbf16>, vector<32x32xbf16>, vector<512x32xf32> -> vector<512x32xf32>
    %c0_13 = arith.constant 0 : index
    %c0_14 = arith.constant 0 : index
    %14 = vector.load %arg7[%c0_13, %c0_14] : memref<1x32xf32, #tpu.memory_space<vmem>>, vector<1x32xf32>
    %15 = vector.broadcast %14 : vector<1x32xf32> to vector<512x32xf32>
    %16 = arith.addf %13, %15 : vector<512x32xf32>
    %17 = arith.truncf %6 : vector<512x4xf32> to vector<512x4xbf16>
    %c0_15 = arith.constant 0 : index
    %c0_16 = arith.constant 0 : index
    %18 = vector.load %arg8[%c0_15, %c0_16] : memref<512x4xbf16, #tpu.memory_space<vmem>>, vector<512x4xbf16>
    tpu.vector_store %arg8[%c0_15, %c0_16], %17 {strides = array<i32>} : memref<512x4xbf16, #tpu.memory_space<vmem>>, vector<512x4xbf16>,
    %19 = arith.truncf %11 : vector<512x4xf32> to vector<512x4xbf16>
    %c0_17 = arith.constant 0 : index
    %c0_18 = arith.constant 0 : index
    %20 = vector.load %arg9[%c0_17, %c0_18] : memref<512x4xbf16, #tpu.memory_space<vmem>>, vector<512x4xbf16>
    tpu.vector_store %arg9[%c0_17, %c0_18], %19 {strides = array<i32>} : memref<512x4xbf16, #tpu.memory_space<vmem>>, vector<512x4xbf16>,
    %21 = arith.truncf %16 : vector<512x32xf32> to vector<512x32xbf16>
    %c0_19 = arith.constant 0 : index
    %c0_20 = arith.constant 0 : index
    %22 = vector.load %arg10[%c0_19, %c0_20] : memref<512x32xbf16, #tpu.memory_space<vmem>>, vector<512x32xbf16>
    tpu.vector_store %arg10[%c0_19, %c0_20], %21 {strides = array<i32>} : memref<512x32xbf16, #tpu.memory_space<vmem>>, vector<512x32xbf16>,
    return
  }
  func.func @transform_0(%arg0: i32) -> (i32, i32) {
    %c0_i32 = arith.constant 0 : i32
    %c0_i32_0 = arith.constant 0 : i32
    return %arg0, %c0_i32 : i32, i32
  }
  func.func @transform_1(%arg0: i32) -> (i32, i32) {
    %c0_i32 = arith.constant 0 : i32
    %c0_i32_0 = arith.constant 0 : i32
    %c0_i32_1 = arith.constant 0 : i32
    return %c0_i32, %c0_i32_0 : i32, i32
  }
  func.func @transform_2(%arg0: i32) -> (i32, i32) {
    %c0_i32 = arith.constant 0 : i32
    %c0_i32_0 = arith.constant 0 : i32
    %c0_i32_1 = arith.constant 0 : i32
    return %c0_i32, %c0_i32_0 : i32, i32
  }
  func.func @transform_3(%arg0: i32) -> (i32, i32) {
    %c0_i32 = arith.constant 0 : i32
    %c0_i32_0 = arith.constant 0 : i32
    %c0_i32_1 = arith.constant 0 : i32
    return %c0_i32, %c0_i32_0 : i32, i32
  }
  func.func @transform_4(%arg0: i32) -> (i32, i32) {
    %c0_i32 = arith.constant 0 : i32
    %c0_i32_0 = arith.constant 0 : i32
    %c0_i32_1 = arith.constant 0 : i32
    return %c0_i32, %c0_i32_0 : i32, i32
  }
  func.func @transform_5(%arg0: i32) -> (i32, i32) {
    %c0_i32 = arith.constant 0 : i32
    %c0_i32_0 = arith.constant 0 : i32
    %c0_i32_1 = arith.constant 0 : i32
    return %c0_i32, %c0_i32_0 : i32, i32
  }
  func.func @transform_6(%arg0: i32) -> (i32, i32) {
    %c0_i32 = arith.constant 0 : i32
    %c0_i32_0 = arith.constant 0 : i32
    %c0_i32_1 = arith.constant 0 : i32
    return %c0_i32, %c0_i32_0 : i32, i32
  }
  func.func @transform_7(%arg0: i32) -> (i32, i32) {
    %c0_i32 = arith.constant 0 : i32
    %c0_i32_0 = arith.constant 0 : i32
    return %arg0, %c0_i32 : i32, i32
  }
  func.func @transform_8(%arg0: i32) -> (i32, i32) {
    %c0_i32 = arith.constant 0 : i32
    %c0_i32_0 = arith.constant 0 : i32
    return %arg0, %c0_i32 : i32, i32
  }
  func.func @transform_9(%arg0: i32) -> (i32, i32) {
    %c0_i32 = arith.constant 0 : i32
    %c0_i32_0 = arith.constant 0 : i32
    return %arg0, %c0_i32 : i32, i32
  }
}

</mosaic_0001>

<bundles_post_ra>
// kernel: tpu_custom_call.1
= control target key start
LH: loop header
LB: loop body
LE: loop exit
PB: predicated region body
PF: predicated region fallthrough
CT: control target
= control target key end

     0   :  { %vm149_vm0 = vcmask 261120   ;;  %vm1415_vm1 = vcmask 27648   ;;  %vm2056_vm2 = vcmask 257024   ;;  %s4404_s1 = inlined_call_operand.vmem [shape: bf16[32,4], index: 1, kind: input, shape index: {}]   ;;  %s4405_s0 = inlined_call_operand.vmem [shape: f32[512,32], index: 0, kind: input, shape index: {}]   ;;  %s4406_s3 = inlined_call_operand.vmem [shape: bf16[32,4], index: 3, kind: input, shape index: {}]   ;;  %s4407_s5 = inlined_call_operand.vmem [shape: bf16[32,32], index: 5, kind: input, shape index: {}]   ;;  %s4408_s2 = inlined_call_operand.vmem [shape: f32[1,4], index: 2, kind: input, shape index: {}]   ;;  %s4409_s7 = inlined_call_operand.vmem [shape: bf16[512,4], index: 7, kind: output, shape index: {0}]   ;;  %s4410_s4 = inlined_call_operand.vmem [shape: f32[1,4], index: 4, kind: input, shape index: {}]   ;;  %s4411_s6 = inlined_call_operand.vmem [shape: f32[1,32], index: 6, kind: input, shape index: {}]   ;;  %s4412_s8 = inlined_call_operand.vmem [shape: bf16[512,4], index: 8, kind: output, shape index: {1}]   ;;  %s4413_s9 = inlined_call_operand.vmem [shape: bf16[512,32], index: 9, kind: output, shape index: {2}]  }
   0x1   :  { %v2932_v0 = vld [vmem:[%s4404_s1] sm:$0xff]   ;;  %v2933_v1 = vld [vmem:[%s4404_s1 + $0x8] sm:$0xff]   ;;  %v32_v7 = vld [vmem:[%s4405_s0 + $0x10] sm:$0xff] }
   0x2   :  { %2724 = vmatprep.subr.bf16.mxu0 %v2932_v0  ;;  %2928 = vmatprep.subr.bf16.mxu1 %v2932_v0  ;;  %v30_v2 = vld [vmem:[%s4405_s0] sm:$0xff]  ;;  %v31_v3 = vld [vmem:[%s4405_s0 + $0x8] sm:$0xff]  ;;  %v33_v8 = vld [vmem:[%s4405_s0 + $0x18] sm:$0xff] }
   0x3   :  { %v62_v4 = vld [vmem:[%s4405_s0 + $0x100] sm:$0xff]  ;;  %2725 = vmatpush3.bf16.msra.mxu0 %v2932_v0  ;;  %2930 = vmatpush3.bf16.msra.mxu1 %v2932_v0  ;;  %v3003_v5 = vpack.c.bf16 %v31_v3, %v30_v2  ;;  %v63_v6 = vld [vmem:[%s4405_s0 + $0x108] sm:$0xff]  ;;  %v64_v10 = vld [vmem:[%s4405_s0 + $0x110] sm:$0xff]  ;;  %v3029_v13 = vpack.c.bf16 %v33_v8, %v32_v7 }
   0x4   :  { %2726 = vmatprep.subr.bf16.mxu0 %v2933_v1  ;;  %2929 = vmatprep.subr.bf16.mxu1 %v2933_v1  ;;  %v3014_v9 = vpack.c.bf16 %v63_v6, %v62_v4  ;;  %v65_v11 = vld [vmem:[%s4405_s0 + $0x118] sm:$0xff]  ;;  %v2934_v12 = vld [vmem:[%s4406_s3] sm:$0xff]   ;;  %v35_v17 = vld [vmem:[%s4405_s0 + $0x28] sm:$0xff] }
   0x5   :  { %2728 = vmatprep.mubr.msk.bf16.mxu0 %vm149_vm0, %v3003_v5  ;;  %v3031_v14 = vpack.c.bf16 %v65_v11, %v64_v10  ;;  %v2935_v15 = vld [vmem:[%s4407_s5] sm:$0xff]   ;;  %v67_v19 = vld [vmem:[%s4405_s0 + $0x128] sm:$0xff]  ;;  %v36_v22 = vld [vmem:[%s4405_s0 + $0x30] sm:$0xff] }
   0x6   :  { %2760 = vmatprep.mubr.msk.bf16.mxu1 %vm149_vm0, %v3014_v9  ;;  %v34_v16 = vld [vmem:[%s4405_s0 + $0x20] sm:$0xff]  ;;  %v37_v23 = vld [vmem:[%s4405_s0 + $0x38] sm:$0xff]  ;;  %v68_v24 = vld [vmem:[%s4405_s0 + $0x130] sm:$0xff] }
   0x7   :  { %2727 = vmatpush3.bf16.msra.mxu0 %v2933_v1  ;;  %2931 = vmatpush3.bf16.msra.mxu1 %v2933_v1  ;;  %v66_v18 = vld [vmem:[%s4405_s0 + $0x120] sm:$0xff]  ;;  %v3048_v20 = vpack.c.bf16 %v35_v17, %v34_v16  ;;  %v69_v25 = vld [vmem:[%s4405_s0 + $0x138] sm:$0xff]  ;;  %v39_v27 = vld [vmem:[%s4405_s0 + $0x48] sm:$0xff]  ;;  %v3084_v30 = vpack.c.bf16 %v37_v23, %v36_v22 }
   0x8   :  { %2792 = vmatprep.subr.bf16.mxu1 %v2934_v12  ;;  %2860 = vmatprep.subr.bf16.mxu0 %v2935_v15  ;;  %v3050_v21 = vpack.c.bf16 %v67_v19, %v66_v18  ;;  %v38_v26 = vld [vmem:[%s4405_s0 + $0x40] sm:$0xff]  ;;  %v71_v29 = vld [vmem:[%s4405_s0 + $0x148] sm:$0xff]  ;;  %v3086_v31 = vpack.c.bf16 %v69_v25, %v68_v24  ;;  %v40_v34 = vld [vmem:[%s4405_s0 + $0x50] sm:$0xff] }
   0x9   :  { %v70_v28 = vld [vmem:[%s4405_s0 + $0x140] sm:$0xff]  ;;  %v3088_v32 = vpack.c.bf16 %v39_v27, %v38_v26  ;;  %v41_v35 = vld [vmem:[%s4405_s0 + $0x58] sm:$0xff]  ;;  %v72_v36 = vld [vmem:[%s4405_s0 + $0x150] sm:$0xff] }
   0xa   :  { %2729 = vmatmul.mubr.msk.bf16.vlgmr.msra.gmra.mrb[0].mxu0 %vm149_vm0, %v3029_v13  ;;  %2761 = vmatmul.mubr.msk.bf16.vlgmr.msra.gmra.mrb[0].mxu1 %vm149_vm0, %v3031_v14  ;;  %v3090_v33 = vpack.c.bf16 %v71_v29, %v70_v28  ;;  %v2936_v37 = vld [vmem:[%s4406_s3 + $0x8] sm:$0xff]   ;;  %v73_v38 = vld [vmem:[%s4405_s0 + $0x158] sm:$0xff]  ;;  %v42_v39 = vld [vmem:[%s4405_s0 + $0x60] sm:$0xff]  ;;  %v3130_v44 = vpack.c.bf16 %v41_v35, %v40_v34 }
   0xb   :  { %2793 = vmatpush3.bf16.msra.mxu1 %v2934_v12  ;;  %2861 = vmatpush3.bf16.msra.mxu0 %v2935_v15  ;;  %v2937_v40 = vld [vmem:[%s4407_s5 + $0x8] sm:$0xff]   ;;  %v74_v42 = vld [vmem:[%s4405_s0 + $0x160] sm:$0xff]  ;;  %v3132_v45 = vpack.c.bf16 %v73_v38, %v72_v36  ;;  %v44_v48 = vld [vmem:[%s4405_s0 + $0x70] sm:$0xff] }
   0xc   :  { %2732 = vmatprep.mubr.msk.bf16.mxu0 %vm149_vm0, %v3048_v20  ;;  %2764 = vmatprep.mubr.msk.bf16.mxu1 %vm149_vm0, %v3050_v21  ;;  %v43_v41 = vld [vmem:[%s4405_s0 + $0x68] sm:$0xff]  ;;  %v45_v49 = vld [vmem:[%s4405_s0 + $0x78] sm:$0xff]  ;;  %v76_v50 = vld [vmem:[%s4405_s0 + $0x170] sm:$0xff] }
   0xd   :  { %v75_v43 = vld [vmem:[%s4405_s0 + $0x168] sm:$0xff]  ;;  %2794 = vmatprep.subr.bf16.mxu1 %v2936_v37  ;;  %2862 = vmatprep.subr.bf16.mxu0 %v2937_v40  ;;  %v3134_v46 = vpack.c.bf16 %v43_v41, %v42_v39  ;;  %v77_v51 = vld [vmem:[%s4405_s0 + $0x178] sm:$0xff]  ;;  %v46_v52 = vld [vmem:[%s4405_s0 + $0x80] sm:$0xff]  ;;  %v3170_v56 = vpack.c.bf16 %v45_v49, %v44_v48 }
   0xe   :  { %v3136_v47 = vpack.c.bf16 %v75_v43, %v74_v42  ;;  %v47_v53 = vld [vmem:[%s4405_s0 + $0x88] sm:$0xff]  ;;  %v78_v54 = vld [vmem:[%s4405_s0 + $0x180] sm:$0xff]  ;;  %v3172_v57 = vpack.c.bf16 %v77_v51, %v76_v50  ;;  %v48_v60 = vld [vmem:[%s4405_s0 + $0x90] sm:$0xff] }
   0xf   :  { %2795 = vmatpush3.bf16.msra.mxu1 %v2936_v37  ;;  %2863 = vmatpush3.bf16.msra.mxu0 %v2937_v40  ;;  %v79_v55 = vld [vmem:[%s4405_s0 + $0x188] sm:$0xff]  ;;  %v3174_v58 = vpack.c.bf16 %v47_v53, %v46_v52  ;;  %v49_v61 = vld [vmem:[%s4405_s0 + $0x98] sm:$0xff]  ;;  %v80_v62 = vld [vmem:[%s4405_s0 + $0x190] sm:$0xff] }
  0x10   :  { %v3176_v59 = vpack.c.bf16 %v79_v55, %v78_v54  ;;  %v81_v63 = vld [vmem:[%s4405_s0 + $0x198] sm:$0xff]  ;;  %v50_v0 = vld [vmem:[%s4405_s0 + $0xa0] sm:$0xff]  ;;  %v51_v1 = vld [vmem:[%s4405_s0 + $0xa8] sm:$0xff]  ;;  %v3210_v4 = vpack.c.bf16 %v49_v61, %v48_v60 }
  0x11   :  { %v82_v2 = vld [vmem:[%s4405_s0 + $0x1a0] sm:$0xff]  ;;  %v83_v3 = vld [vmem:[%s4405_s0 + $0x1a8] sm:$0xff]  ;;  %v3212_v6 = vpack.c.bf16 %v81_v63, %v80_v62  ;;  %v3214_v7 = vpack.c.bf16 %v51_v1, %v50_v0  ;;  %v52_v10 = vld [vmem:[%s4405_s0 + $0xb0] sm:$0xff] }
  0x12   :  { %2733 = vmatmul.mubr.msk.bf16.gmra.mrb[4].mxu0 %vm149_vm0, %v3084_v30  ;;  %2765 = vmatmul.mubr.msk.bf16.gmra.mrb[4].mxu1 %vm149_vm0, %v3086_v31  ;;  %v3216_v8 = vpack.c.bf16 %v83_v3, %v82_v2  ;;  %v53_v11 = vld [vmem:[%s4405_s0 + $0xb8] sm:$0xff]  ;;  %v84_v12 = vld [vmem:[%s4405_s0 + $0x1b0] sm:$0xff]  ;;  %v54_v16 = vld [vmem:[%s4405_s0 + $0xc0] sm:$0xff] }
  0x13   :  { %2736 = vmatprep.mubr.msk.bf16.mxu0 %vm149_vm0, %v3088_v32  ;;  %2768 = vmatprep.mubr.msk.bf16.mxu1 %vm149_vm0, %v3090_v33  ;;  %v85_v15 = vld [vmem:[%s4405_s0 + $0x1b8] sm:$0xff]  ;;  %v55_v17 = vld [vmem:[%s4405_s0 + $0xc8] sm:$0xff]  ;;  %v86_v18 = vld [vmem:[%s4405_s0 + $0x1c0] sm:$0xff]  ;;  %v105_v22 = vpack.c.bf16 %v53_v11, %v52_v10 }
  0x14   :  { %v87_v19 = vld [vmem:[%s4405_s0 + $0x1c8] sm:$0xff]  ;;  %v3250_v23 = vpack.c.bf16 %v85_v15, %v84_v12  ;;  %v106_v24 = vpack.c.bf16 %v55_v17, %v54_v16  ;;  %v56_v26 = vld [vmem:[%s4405_s0 + $0xd0] sm:$0xff]  ;;  %v57_v27 = vld [vmem:[%s4405_s0 + $0xd8] sm:$0xff] }
  0x15   :  { %v3252_v25 = vpack.c.bf16 %v87_v19, %v86_v18  ;;  %v88_v28 = vld [vmem:[%s4405_s0 + $0x1d0] sm:$0xff]  ;;  %v89_v29 = vld [vmem:[%s4405_s0 + $0x1d8] sm:$0xff]  ;;  %v58_v34 = vld [vmem:[%s4405_s0 + $0xe0] sm:$0xff]  ;;  %v107_v38 = vpack.c.bf16 %v57_v27, %v56_v26 }
  0x16   :  { %v59_v35 = vld [vmem:[%s4405_s0 + $0xe8] sm:$0xff]  ;;  %v90_v36 = vld [vmem:[%s4405_s0 + $0x1e0] sm:$0xff]  ;;  %v3284_v39 = vpack.c.bf16 %v89_v29, %v88_v28  ;;  %v60_v42 = vld [vmem:[%s4405_s0 + $0xf0] sm:$0xff] }
  0x17   :  { %v91_v37 = vld [vmem:[%s4405_s0 + $0x1e8] sm:$0xff]  ;;  %v108_v40 = vpack.c.bf16 %v59_v35, %v58_v34  ;;  %v61_v43 = vld [vmem:[%s4405_s0 + $0xf8] sm:$0xff]  ;;  %v92_v48 = vld [vmem:[%s4405_s0 + $0x1f0] sm:$0xff] }
  0x18   :  { %v3286_v41 = vpack.c.bf16 %v91_v37, %v90_v36  ;;  %v93_v49 = vld [vmem:[%s4405_s0 + $0x1f8] sm:$0xff]  ;;  %v109_v50 = vpack.c.bf16 %v61_v43, %v60_v42 }
  0x19   :  { %v3306_v51 = vpack.c.bf16 %v93_v49, %v92_v48 }
  0x1a   :  { %2737 = vmatmul.mubr.msk.bf16.gmra.mrb[8].mxu0 %vm149_vm0, %v3130_v44  ;;  %2769 = vmatmul.mubr.msk.bf16.gmra.mrb[8].mxu1 %vm149_vm0, %v3132_v45 }
  0x1b   :  { %2740 = vmatprep.mubr.msk.bf16.mxu0 %vm149_vm0, %v3134_v46  ;;  %2772 = vmatprep.mubr.msk.bf16.mxu1 %vm149_vm0, %v3136_v47 }
  0x22   :  { %2741 = vmatmul.mubr.msk.bf16.gmra.mrb[12].mxu0 %vm149_vm0, %v3170_v56  ;;  %2773 = vmatmul.mubr.msk.bf16.gmra.mrb[12].mxu1 %vm149_vm0, %v3172_v57 }
  0x23   :  { %2744 = vmatprep.mubr.msk.bf16.mxu0 %vm149_vm0, %v3174_v58  ;;  %2776 = vmatprep.mubr.msk.bf16.mxu1 %vm149_vm0, %v3176_v59 }
  0x2a   :  { %2745 = vmatmul.mubr.msk.bf16.gmra.mrb[16].mxu0 %vm149_vm0, %v3210_v4  ;;  %2777 = vmatmul.mubr.msk.bf16.gmra.mrb[16].mxu1 %vm149_vm0, %v3212_v6 }
  0x2b   :  { %2748 = vmatprep.mubr.msk.bf16.mxu0 %vm149_vm0, %v3214_v7  ;;  %2780 = vmatprep.mubr.msk.bf16.mxu1 %vm149_vm0, %v3216_v8 }
  0x32   :  { %2749 = vmatmul.mubr.msk.bf16.gmra.mrb[20].mxu0 %vm149_vm0, %v105_v22  ;;  %2781 = vmatmul.mubr.msk.bf16.gmra.mrb[20].mxu1 %vm149_vm0, %v3250_v23 }
  0x33   :  { %2752 = vmatprep.mubr.msk.bf16.mxu0 %vm149_vm0, %v106_v24  ;;  %2784 = vmatprep.mubr.msk.bf16.mxu1 %vm149_vm0, %v3252_v25 }
  0x3a   :  { %2753 = vmatmul.mubr.msk.bf16.gmra.mrb[24].mxu0 %vm149_vm0, %v107_v38  ;;  %2785 = vmatmul.mubr.msk.bf16.gmra.mrb[24].mxu1 %vm149_vm0, %v3284_v39 }
  0x3b   :  { %2756 = vmatprep.mubr.msk.bf16.mxu0 %vm149_vm0, %v108_v40  ;;  %2788 = vmatprep.mubr.msk.bf16.mxu1 %vm149_vm0, %v3286_v41 }
  0x42   :  { %2757 = vmatmul.mubr.msk.bf16.gmra.mrb[28].mxu0 %vm149_vm0, %v109_v50  ;;  %2789 = vmatmul.mubr.msk.bf16.gmra.mrb[28].mxu1 %vm149_vm0, %v3306_v51 }
  0x43   :  { %2796 = vmatprep.mubr.msk.bf16.mxu1 %vm149_vm0, %v3003_v5  ;;  %2864 = vmatprep.mubr.msk.bf16.mxu0 %vm149_vm0, %v3003_v5  ;;  %v3432_v5 = vld [vmem:[%s4408_s2] ss:$0 sm:$0xff] }
  0x4a   :  { %2797 = vmatmul.mubr.msk.bf16.vlgmr.msra.gmra.mrb[32].mxu1 %vm149_vm0, %v3029_v13  ;;  %2865 = vmatmul.mubr.msk.bf16.vlgmr.msra.gmra.mrb[32].mxu0 %vm149_vm0, %v3029_v13 }
  0x4b   :  { %2800 = vmatprep.mubr.msk.bf16.mxu1 %vm149_vm0, %v3048_v20  ;;  %2868 = vmatprep.mubr.msk.bf16.mxu0 %vm149_vm0, %v3048_v20 }
  0x52   :  { %2801 = vmatmul.mubr.msk.bf16.gmra.mrb[36].mxu1 %vm149_vm0, %v3084_v30  ;;  %2869 = vmatmul.mubr.msk.bf16.gmra.mrb[36].mxu0 %vm149_vm0, %v3084_v30 }
  0x53   :  { %2804 = vmatprep.mubr.msk.bf16.mxu1 %vm149_vm0, %v3088_v32  ;;  %2872 = vmatprep.mubr.msk.bf16.mxu0 %vm149_vm0, %v3088_v32 }
  0x5a   :  { %2805 = vmatmul.mubr.msk.bf16.gmra.mrb[40].mxu1 %vm149_vm0, %v3130_v44  ;;  %2873 = vmatmul.mubr.msk.bf16.gmra.mrb[40].mxu0 %vm149_vm0, %v3130_v44 }
  0x5b   :  { %2808 = vmatprep.mubr.msk.bf16.mxu1 %vm149_vm0, %v3134_v46  ;;  %2876 = vmatprep.mubr.msk.bf16.mxu0 %vm149_vm0, %v3134_v46 }
  0x62   :  { %2809 = vmatmul.mubr.msk.bf16.gmra.mrb[44].mxu1 %vm149_vm0, %v3170_v56  ;;  %2877 = vmatmul.mubr.msk.bf16.gmra.mrb[44].mxu0 %vm149_vm0, %v3170_v56 }
  0x63   :  { %2812 = vmatprep.mubr.msk.bf16.mxu1 %vm149_vm0, %v3174_v58  ;;  %2880 = vmatprep.mubr.msk.bf16.mxu0 %vm149_vm0, %v3174_v58 }
  0x6a   :  { %2813 = vmatmul.mubr.msk.bf16.gmra.mrb[48].mxu1 %vm149_vm0, %v3210_v4  ;;  %2881 = vmatmul.mubr.msk.bf16.gmra.mrb[48].mxu0 %vm149_vm0, %v3210_v4 }
  0x6b   :  { %2816 = vmatprep.mubr.msk.bf16.mxu1 %vm149_vm0, %v3214_v7  ;;  %2884 = vmatprep.mubr.msk.bf16.mxu0 %vm149_vm0, %v3214_v7 }
  0x72   :  { %2817 = vmatmul.mubr.msk.bf16.gmra.mrb[52].mxu1 %vm149_vm0, %v105_v22  ;;  %2885 = vmatmul.mubr.msk.bf16.gmra.mrb[52].mxu0 %vm149_vm0, %v105_v22 }
  0x73   :  { %2820 = vmatprep.mubr.msk.bf16.mxu1 %vm149_vm0, %v106_v24  ;;  %2888 = vmatprep.mubr.msk.bf16.mxu0 %vm149_vm0, %v106_v24 }
  0x7a   :  { %2821 = vmatmul.mubr.msk.bf16.gmra.mrb[56].mxu1 %vm149_vm0, %v107_v38  ;;  %2889 = vmatmul.mubr.msk.bf16.gmra.mrb[56].mxu0 %vm149_vm0, %v107_v38 }
  0x7b   :  { %2824 = vmatprep.mubr.msk.bf16.mxu1 %vm149_vm0, %v108_v40  ;;  %2892 = vmatprep.mubr.msk.bf16.mxu0 %vm149_vm0, %v108_v40 }
  0x82   :  { %2825 = vmatmul.mubr.msk.bf16.gmra.mrb[60].mxu1 %vm149_vm0, %v109_v50  ;;  %2893 = vmatmul.mubr.msk.bf16.gmra.mrb[60].mxu0 %vm149_vm0, %v109_v50 }
  0x83   :  { %2828 = vmatprep.mubr.msk.bf16.mxu1 %vm149_vm0, %v3014_v9  ;;  %2896 = vmatprep.mubr.msk.bf16.mxu0 %vm149_vm0, %v3014_v9 }
  0x8a   :  { %2829 = vmatmul.mubr.msk.bf16.gmra.mrb[64].mxu1 %vm149_vm0, %v3031_v14  ;;  %2897 = vmatmul.mubr.msk.bf16.gmra.mrb[64].mxu0 %vm149_vm0, %v3031_v14 }
  0x8b   :  { %2832 = vmatprep.mubr.msk.bf16.mxu1 %vm149_vm0, %v3050_v21  ;;  %2900 = vmatprep.mubr.msk.bf16.mxu0 %vm149_vm0, %v3050_v21 }
  0x92   :  { %2833 = vmatmul.mubr.msk.bf16.gmra.mrb[68].mxu1 %vm149_vm0, %v3086_v31  ;;  %2901 = vmatmul.mubr.msk.bf16.gmra.mrb[68].mxu0 %vm149_vm0, %v3086_v31 }
  0x93   :  { %2836 = vmatprep.mubr.msk.bf16.mxu1 %vm149_vm0, %v3090_v33  ;;  %2904 = vmatprep.mubr.msk.bf16.mxu0 %vm149_vm0, %v3090_v33 }
  0x9a   :  { %2837 = vmatmul.mubr.msk.bf16.gmra.mrb[72].mxu1 %vm149_vm0, %v3132_v45  ;;  %2905 = vmatmul.mubr.msk.bf16.gmra.mrb[72].mxu0 %vm149_vm0, %v3132_v45 }
  0x9b   :  { %2840 = vmatprep.mubr.msk.bf16.mxu1 %vm149_vm0, %v3136_v47  ;;  %2908 = vmatprep.mubr.msk.bf16.mxu0 %vm149_vm0, %v3136_v47 }
  0xa2   :  { %2841 = vmatmul.mubr.msk.bf16.gmra.mrb[76].mxu1 %vm149_vm0, %v3172_v57  ;;  %2909 = vmatmul.mubr.msk.bf16.gmra.mrb[76].mxu0 %vm149_vm0, %v3172_v57 }
  0xa3   :  { %2844 = vmatprep.mubr.msk.bf16.mxu1 %vm149_vm0, %v3176_v59  ;;  %2912 = vmatprep.mubr.msk.bf16.mxu0 %vm149_vm0, %v3176_v59 }
  0xaa   :  { %2845 = vmatmul.mubr.msk.bf16.gmra.mrb[80].mxu1 %vm149_vm0, %v3212_v6  ;;  %2913 = vmatmul.mubr.msk.bf16.gmra.mrb[80].mxu0 %vm149_vm0, %v3212_v6 }
  0xab   :  { %2848 = vmatprep.mubr.msk.bf16.mxu1 %vm149_vm0, %v3216_v8  ;;  %2916 = vmatprep.mubr.msk.bf16.mxu0 %vm149_vm0, %v3216_v8 }
  0xb2   :  { %2849 = vmatmul.mubr.msk.bf16.gmra.mrb[84].mxu1 %vm149_vm0, %v3250_v23  ;;  %2917 = vmatmul.mubr.msk.bf16.gmra.mrb[84].mxu0 %vm149_vm0, %v3250_v23 }
  0xb3   :  { %2852 = vmatprep.mubr.msk.bf16.mxu1 %vm149_vm0, %v3252_v25  ;;  %2920 = vmatprep.mubr.msk.bf16.mxu0 %vm149_vm0, %v3252_v25 }
  0xba   :  { %2853 = vmatmul.mubr.msk.bf16.gmra.mrb[88].mxu1 %vm149_vm0, %v3284_v39  ;;  %2921 = vmatmul.mubr.msk.bf16.gmra.mrb[88].mxu0 %vm149_vm0, %v3284_v39 }
  0xbb   :  { %2856 = vmatprep.mubr.msk.bf16.mxu1 %vm149_vm0, %v3286_v41  ;;  %2924 = vmatprep.mubr.msk.bf16.mxu0 %vm149_vm0, %v3286_v41 }
  0xc2   :  { %2857 = vmatmul.mubr.msk.bf16.gmra.mrb[92].mxu1 %vm149_vm0, %v3306_v51  ;;  %2925 = vmatmul.mubr.msk.bf16.gmra.mrb[92].mxu0 %vm149_vm0, %v3306_v51 }
  0xdd   :  { %v2730_v9 = vpop.f32.mrb[0].mxu0  ;;  %v2762_v13 = vpop.f32.mrb[0].mxu1 }
  0xde   :  { %v289_v14 = vadd.f32 %v2730_v9, %v3432_v5  ;;  %v417_v20 = vadd.f32 %v2762_v13, %v3432_v5  ;;  %v280_v21 = vpop.f32.mrb[1].mxu0  ;;  %v408_v30 = vpop.f32.mrb[1].mxu1 }
  0xdf   :  { %v281_v31 = vadd.f32 %v3432_v5, %v280_v21  ;;  %v409_v32 = vadd.f32 %v3432_v5, %v408_v30  ;;  %v2731_v33 = vpop.f32.mrb[2].mxu0  ;;  %v2763_v44 = vpop.f32.mrb[2].mxu1 }
  0xe0   :  { %v2432_v45 = vpack.c.bf16 %v289_v14, %v289_v14  ;;  %v2464_v46 = vpack.c.bf16 %v417_v20, %v417_v20  ;;  %v292_v47 = vadd.f32 %v2731_v33, %v3432_v5  ;;  %v420_v52 = vadd.f32 %v2763_v44, %v3432_v5  ;;  %v283_v53 = vpop.f32.mrb[3].mxu0  ;;  %v411_v54 = vpop.f32.mrb[3].mxu1 }
  0xe1   :  { %v2430_v55 = vpack.c.bf16 %v281_v31, %v281_v31  ;;  %v2462_v56 = vpack.c.bf16 %v409_v32, %v409_v32  ;;  %v284_v57 = vadd.f32 %v3432_v5, %v283_v53  ;;  %v412_v58 = vadd.f32 %v3432_v5, %v411_v54 }
  0xe2   :  { %1418 = vst.msk [vmem:[%s4409_s7 + $0x8] sm:$0xf] %vm1415_vm1, %v2432_v45  ;;  %1450 = vst.msk [vmem:[%s4409_s7 + $0x88] sm:$0xf] %vm1415_vm1, %v2464_v46  ;;  %v2433_v59 = vpack.c.bf16 %v292_v47, %v292_v47  ;;  %v2465_v60 = vpack.c.bf16 %v420_v52, %v420_v52 }
  0xe3   :  { %1416 = vst.msk [vmem:[%s4409_s7] sm:$0xf] %vm1415_vm1, %v2430_v55  ;;  %1448 = vst.msk [vmem:[%s4409_s7 + $0x80] sm:$0xf] %vm1415_vm1, %v2462_v56  ;;  %v2431_v61 = vpack.c.bf16 %v284_v57, %v284_v57  ;;  %v2463_v62 = vpack.c.bf16 %v412_v58, %v412_v58 }
  0xe4   :  { %1419 = vst.msk [vmem:[%s4409_s7 + $0xc] sm:$0xf] %vm1415_vm1, %v2433_v59  ;;  %1451 = vst.msk [vmem:[%s4409_s7 + $0x8c] sm:$0xf] %vm1415_vm1, %v2465_v60 }
  0xe5   :  { %1417 = vst.msk [vmem:[%s4409_s7 + $0x4] sm:$0xf] %vm1415_vm1, %v2431_v61  ;;  %1449 = vst.msk [vmem:[%s4409_s7 + $0x84] sm:$0xf] %vm1415_vm1, %v2463_v62  ;;  %v2734_v63 = vpop.f32.mrb[4].mxu0  ;;  %v2766_v0 = vpop.f32.mrb[4].mxu1 }
  0xe6   :  { %v305_v1 = vadd.f32 %v2734_v63, %v3432_v5  ;;  %v433_v2 = vadd.f32 %v2766_v0, %v3432_v5  ;;  %v296_v3 = vpop.f32.mrb[5].mxu0  ;;  %v424_v4 = vpop.f32.mrb[5].mxu1 }
  0xe7   :  { %v297_v6 = vadd.f32 %v3432_v5, %v296_v3  ;;  %v425_v7 = vadd.f32 %v3432_v5, %v424_v4  ;;  %v2735_v8 = vpop.f32.mrb[6].mxu0  ;;  %v2767_v10 = vpop.f32.mrb[6].mxu1 }
  0xe8   :  { %v2436_v11 = vpack.c.bf16 %v305_v1, %v305_v1  ;;  %v2468_v12 = vpack.c.bf16 %v433_v2, %v433_v2  ;;  %v308_v15 = vadd.f32 %v2735_v8, %v3432_v5  ;;  %v436_v16 = vadd.f32 %v2767_v10, %v3432_v5  ;;  %v299_v17 = vpop.f32.mrb[7].mxu0  ;;  %v427_v18 = vpop.f32.mrb[7].mxu1 }
  0xe9   :  { %v2434_v19 = vpack.c.bf16 %v297_v6, %v297_v6  ;;  %v2466_v22 = vpack.c.bf16 %v425_v7, %v425_v7  ;;  %v300_v23 = vadd.f32 %v3432_v5, %v299_v17  ;;  %v428_v24 = vadd.f32 %v3432_v5, %v427_v18 }
  0xea   :  { %1422 = vst.msk [vmem:[%s4409_s7 + $0x18] sm:$0xf] %vm1415_vm1, %v2436_v11  ;;  %1454 = vst.msk [vmem:[%s4409_s7 + $0x98] sm:$0xf] %vm1415_vm1, %v2468_v12  ;;  %v2437_v25 = vpack.c.bf16 %v308_v15, %v308_v15  ;;  %v2469_v26 = vpack.c.bf16 %v436_v16, %v436_v16 }
  0xeb   :  { %1420 = vst.msk [vmem:[%s4409_s7 + $0x10] sm:$0xf] %vm1415_vm1, %v2434_v19  ;;  %1452 = vst.msk [vmem:[%s4409_s7 + $0x90] sm:$0xf] %vm1415_vm1, %v2466_v22  ;;  %v2435_v27 = vpack.c.bf16 %v300_v23, %v300_v23  ;;  %v2467_v28 = vpack.c.bf16 %v428_v24, %v428_v24 }
  0xec   :  { %1423 = vst.msk [vmem:[%s4409_s7 + $0x1c] sm:$0xf] %vm1415_vm1, %v2437_v25  ;;  %1455 = vst.msk [vmem:[%s4409_s7 + $0x9c] sm:$0xf] %vm1415_vm1, %v2469_v26 }
  0xed   :  { %1421 = vst.msk [vmem:[%s4409_s7 + $0x14] sm:$0xf] %vm1415_vm1, %v2435_v27  ;;  %1453 = vst.msk [vmem:[%s4409_s7 + $0x94] sm:$0xf] %vm1415_vm1, %v2467_v28  ;;  %v2738_v29 = vpop.f32.mrb[8].mxu0  ;;  %v2770_v34 = vpop.f32.mrb[8].mxu1 }
  0xee   :  { %v321_v35 = vadd.f32 %v2738_v29, %v3432_v5  ;;  %v449_v36 = vadd.f32 %v2770_v34, %v3432_v5  ;;  %v312_v37 = vpop.f32.mrb[9].mxu0  ;;  %v440_v38 = vpop.f32.mrb[9].mxu1 }
  0xef   :  { %v313_v39 = vadd.f32 %v3432_v5, %v312_v37  ;;  %v441_v40 = vadd.f32 %v3432_v5, %v440_v38  ;;  %v2739_v41 = vpop.f32.mrb[10].mxu0  ;;  %v2771_v42 = vpop.f32.mrb[10].mxu1 }
  0xf0   :  { %v2440_v43 = vpack.c.bf16 %v321_v35, %v321_v35  ;;  %v2472_v48 = vpack.c.bf16 %v449_v36, %v449_v36  ;;  %v324_v49 = vadd.f32 %v2739_v41, %v3432_v5  ;;  %v452_v50 = vadd.f32 %v2771_v42, %v3432_v5  ;;  %v315_v51 = vpop.f32.mrb[11].mxu0  ;;  %v443_v9 = vpop.f32.mrb[11].mxu1 }
  0xf1   :  { %v2438_v13 = vpack.c.bf16 %v313_v39, %v313_v39  ;;  %v2470_v14 = vpack.c.bf16 %v441_v40, %v441_v40  ;;  %v316_v20 = vadd.f32 %v3432_v5, %v315_v51  ;;  %v444_v21 = vadd.f32 %v3432_v5, %v443_v9 }
  0xf2   :  { %1426 = vst.msk [vmem:[%s4409_s7 + $0x28] sm:$0xf] %vm1415_vm1, %v2440_v43  ;;  %1458 = vst.msk [vmem:[%s4409_s7 + $0xa8] sm:$0xf] %vm1415_vm1, %v2472_v48  ;;  %v2441_v30 = vpack.c.bf16 %v324_v49, %v324_v49  ;;  %v2473_v31 = vpack.c.bf16 %v452_v50, %v452_v50 }
  0xf3   :  { %1424 = vst.msk [vmem:[%s4409_s7 + $0x20] sm:$0xf] %vm1415_vm1, %v2438_v13  ;;  %1456 = vst.msk [vmem:[%s4409_s7 + $0xa0] sm:$0xf] %vm1415_vm1, %v2470_v14  ;;  %v2439_v32 = vpack.c.bf16 %v316_v20, %v316_v20  ;;  %v2471_v33 = vpack.c.bf16 %v444_v21, %v444_v21 }
  0xf4   :  { %1427 = vst.msk [vmem:[%s4409_s7 + $0x2c] sm:$0xf] %vm1415_vm1, %v2441_v30  ;;  %1459 = vst.msk [vmem:[%s4409_s7 + $0xac] sm:$0xf] %vm1415_vm1, %v2473_v31 }
  0xf5   :  { %1425 = vst.msk [vmem:[%s4409_s7 + $0x24] sm:$0xf] %vm1415_vm1, %v2439_v32  ;;  %1457 = vst.msk [vmem:[%s4409_s7 + $0xa4] sm:$0xf] %vm1415_vm1, %v2471_v33  ;;  %v2742_v44 = vpop.f32.mrb[12].mxu0  ;;  %v2774_v45 = vpop.f32.mrb[12].mxu1 }
  0xf6   :  { %v337_v46 = vadd.f32 %v2742_v44, %v3432_v5  ;;  %v465_v47 = vadd.f32 %v2774_v45, %v3432_v5  ;;  %v328_v52 = vpop.f32.mrb[13].mxu0  ;;  %v456_v53 = vpop.f32.mrb[13].mxu1 }
  0xf7   :  { %v329_v54 = vadd.f32 %v3432_v5, %v328_v52  ;;  %v457_v55 = vadd.f32 %v3432_v5, %v456_v53  ;;  %v2743_v56 = vpop.f32.mrb[14].mxu0  ;;  %v2775_v57 = vpop.f32.mrb[14].mxu1 }
  0xf8   :  { %v2444_v58 = vpack.c.bf16 %v337_v46, %v337_v46  ;;  %v2476_v59 = vpack.c.bf16 %v465_v47, %v465_v47  ;;  %v340_v60 = vadd.f32 %v2743_v56, %v3432_v5  ;;  %v468_v61 = vadd.f32 %v2775_v57, %v3432_v5  ;;  %v331_v62 = vpop.f32.mrb[15].mxu0  ;;  %v459_v63 = vpop.f32.mrb[15].mxu1 }
  0xf9   :  { %v2442_v0 = vpack.c.bf16 %v329_v54, %v329_v54  ;;  %v2474_v1 = vpack.c.bf16 %v457_v55, %v457_v55  ;;  %v332_v2 = vadd.f32 %v3432_v5, %v331_v62  ;;  %v460_v3 = vadd.f32 %v3432_v5, %v459_v63 }
  0xfa   :  { %1430 = vst.msk [vmem:[%s4409_s7 + $0x38] sm:$0xf] %vm1415_vm1, %v2444_v58  ;;  %1462 = vst.msk [vmem:[%s4409_s7 + $0xb8] sm:$0xf] %vm1415_vm1, %v2476_v59  ;;  %v2445_v4 = vpack.c.bf16 %v340_v60, %v340_v60  ;;  %v2477_v6 = vpack.c.bf16 %v468_v61, %v468_v61 }
  0xfb   :  { %1428 = vst.msk [vmem:[%s4409_s7 + $0x30] sm:$0xf] %vm1415_vm1, %v2442_v0  ;;  %1460 = vst.msk [vmem:[%s4409_s7 + $0xb0] sm:$0xf] %vm1415_vm1, %v2474_v1  ;;  %v2443_v7 = vpack.c.bf16 %v332_v2, %v332_v2  ;;  %v2475_v8 = vpack.c.bf16 %v460_v3, %v460_v3 }
  0xfc   :  { %1431 = vst.msk [vmem:[%s4409_s7 + $0x3c] sm:$0xf] %vm1415_vm1, %v2445_v4  ;;  %1463 = vst.msk [vmem:[%s4409_s7 + $0xbc] sm:$0xf] %vm1415_vm1, %v2477_v6 }
  0xfd   :  { %1429 = vst.msk [vmem:[%s4409_s7 + $0x34] sm:$0xf] %vm1415_vm1, %v2443_v7  ;;  %1461 = vst.msk [vmem:[%s4409_s7 + $0xb4] sm:$0xf] %vm1415_vm1, %v2475_v8  ;;  %v2746_v10 = vpop.f32.mrb[16].mxu0  ;;  %v2778_v11 = vpop.f32.mrb[16].mxu1 }
  0xfe   :  { %v353_v12 = vadd.f32 %v2746_v10, %v3432_v5  ;;  %v481_v15 = vadd.f32 %v2778_v11, %v3432_v5  ;;  %v344_v16 = vpop.f32.mrb[17].mxu0  ;;  %v472_v17 = vpop.f32.mrb[17].mxu1 }
  0xff   :  { %v345_v18 = vadd.f32 %v3432_v5, %v344_v16  ;;  %v473_v19 = vadd.f32 %v3432_v5, %v472_v17  ;;  %v2747_v22 = vpop.f32.mrb[18].mxu0  ;;  %v2779_v23 = vpop.f32.mrb[18].mxu1 }
 0x100   :  { %v2448_v24 = vpack.c.bf16 %v353_v12, %v353_v12  ;;  %v2480_v25 = vpack.c.bf16 %v481_v15, %v481_v15  ;;  %v356_v26 = vadd.f32 %v2747_v22, %v3432_v5  ;;  %v484_v27 = vadd.f32 %v2779_v23, %v3432_v5  ;;  %v347_v28 = vpop.f32.mrb[19].mxu0  ;;  %v475_v29 = vpop.f32.mrb[19].mxu1 }
 0x101   :  { %v2446_v34 = vpack.c.bf16 %v345_v18, %v345_v18  ;;  %v2478_v35 = vpack.c.bf16 %v473_v19, %v473_v19  ;;  %v348_v36 = vadd.f32 %v3432_v5, %v347_v28  ;;  %v476_v37 = vadd.f32 %v3432_v5, %v475_v29 }
 0x102   :  { %1434 = vst.msk [vmem:[%s4409_s7 + $0x48] sm:$0xf] %vm1415_vm1, %v2448_v24  ;;  %1466 = vst.msk [vmem:[%s4409_s7 + $0xc8] sm:$0xf] %vm1415_vm1, %v2480_v25  ;;  %v2449_v38 = vpack.c.bf16 %v356_v26, %v356_v26  ;;  %v2481_v39 = vpack.c.bf16 %v484_v27, %v484_v27 }
 0x103   :  { %1432 = vst.msk [vmem:[%s4409_s7 + $0x40] sm:$0xf] %vm1415_vm1, %v2446_v34  ;;  %1464 = vst.msk [vmem:[%s4409_s7 + $0xc0] sm:$0xf] %vm1415_vm1, %v2478_v35  ;;  %v2447_v40 = vpack.c.bf16 %v348_v36, %v348_v36  ;;  %v2479_v41 = vpack.c.bf16 %v476_v37, %v476_v37 }
 0x104   :  { %1435 = vst.msk [vmem:[%s4409_s7 + $0x4c] sm:$0xf] %vm1415_vm1, %v2449_v38  ;;  %1467 = vst.msk [vmem:[%s4409_s7 + $0xcc] sm:$0xf] %vm1415_vm1, %v2481_v39 }
 0x105   :  { %1433 = vst.msk [vmem:[%s4409_s7 + $0x44] sm:$0xf] %vm1415_vm1, %v2447_v40  ;;  %1465 = vst.msk [vmem:[%s4409_s7 + $0xc4] sm:$0xf] %vm1415_vm1, %v2479_v41  ;;  %v2750_v42 = vpop.f32.mrb[20].mxu0  ;;  %v2782_v43 = vpop.f32.mrb[20].mxu1 }
 0x106   :  { %v369_v48 = vadd.f32 %v2750_v42, %v3432_v5  ;;  %v497_v49 = vadd.f32 %v2782_v43, %v3432_v5  ;;  %v360_v50 = vpop.f32.mrb[21].mxu0  ;;  %v488_v51 = vpop.f32.mrb[21].mxu1 }
 0x107   :  { %v361_v9 = vadd.f32 %v3432_v5, %v360_v50  ;;  %v489_v13 = vadd.f32 %v3432_v5, %v488_v51  ;;  %v2751_v14 = vpop.f32.mrb[22].mxu0  ;;  %v2783_v20 = vpop.f32.mrb[22].mxu1 }
 0x108   :  { %v2452_v21 = vpack.c.bf16 %v369_v48, %v369_v48  ;;  %v2484_v30 = vpack.c.bf16 %v497_v49, %v497_v49  ;;  %v372_v31 = vadd.f32 %v2751_v14, %v3432_v5  ;;  %v500_v32 = vadd.f32 %v2783_v20, %v3432_v5  ;;  %v363_v33 = vpop.f32.mrb[23].mxu0  ;;  %v491_v44 = vpop.f32.mrb[23].mxu1  ;;  %v3741_v14 = vld [vmem:[%s4410_s4] ss:$0 sm:$0xff] }
 0x109   :  { %v2450_v45 = vpack.c.bf16 %v361_v9, %v361_v9  ;;  %v2482_v46 = vpack.c.bf16 %v489_v13, %v489_v13  ;;  %v364_v47 = vadd.f32 %v3432_v5, %v363_v33  ;;  %v492_v52 = vadd.f32 %v3432_v5, %v491_v44  ;;  %v3746_v20 = vld [vmem:[%s4411_s6] ss:$0 sm:$0xff] }
 0x10a   :  { %1438 = vst.msk [vmem:[%s4409_s7 + $0x58] sm:$0xf] %vm1415_vm1, %v2452_v21  ;;  %1470 = vst.msk [vmem:[%s4409_s7 + $0xd8] sm:$0xf] %vm1415_vm1, %v2484_v30  ;;  %v2453_v53 = vpack.c.bf16 %v372_v31, %v372_v31  ;;  %v2485_v54 = vpack.c.bf16 %v500_v32, %v500_v32 }
 0x10b   :  { %1436 = vst.msk [vmem:[%s4409_s7 + $0x50] sm:$0xf] %vm1415_vm1, %v2450_v45  ;;  %1468 = vst.msk [vmem:[%s4409_s7 + $0xd0] sm:$0xf] %vm1415_vm1, %v2482_v46  ;;  %v2451_v55 = vpack.c.bf16 %v364_v47, %v364_v47  ;;  %v2483_v56 = vpack.c.bf16 %v492_v52, %v492_v52 }
 0x10c   :  { %1439 = vst.msk [vmem:[%s4409_s7 + $0x5c] sm:$0xf] %vm1415_vm1, %v2453_v53  ;;  %1471 = vst.msk [vmem:[%s4409_s7 + $0xdc] sm:$0xf] %vm1415_vm1, %v2485_v54 }
 0x10d   :  { %1437 = vst.msk [vmem:[%s4409_s7 + $0x54] sm:$0xf] %vm1415_vm1, %v2451_v55  ;;  %1469 = vst.msk [vmem:[%s4409_s7 + $0xd4] sm:$0xf] %vm1415_vm1, %v2483_v56  ;;  %v2754_v57 = vpop.f32.mrb[24].mxu0  ;;  %v2786_v58 = vpop.f32.mrb[24].mxu1 }
 0x10e   :  { %v385_v59 = vadd.f32 %v2754_v57, %v3432_v5  ;;  %v513_v60 = vadd.f32 %v2786_v58, %v3432_v5  ;;  %v376_v61 = vpop.f32.mrb[25].mxu0  ;;  %v504_v62 = vpop.f32.mrb[25].mxu1 }
 0x10f   :  { %v377_v63 = vadd.f32 %v3432_v5, %v376_v61  ;;  %v505_v0 = vadd.f32 %v3432_v5, %v504_v62  ;;  %v2755_v1 = vpop.f32.mrb[26].mxu0  ;;  %v2787_v2 = vpop.f32.mrb[26].mxu1 }
 0x110   :  { %v2456_v3 = vpack.c.bf16 %v385_v59, %v385_v59  ;;  %v2488_v4 = vpack.c.bf16 %v513_v60, %v513_v60  ;;  %v388_v6 = vadd.f32 %v2755_v1, %v3432_v5  ;;  %v516_v7 = vadd.f32 %v2787_v2, %v3432_v5  ;;  %v379_v8 = vpop.f32.mrb[27].mxu0  ;;  %v507_v10 = vpop.f32.mrb[27].mxu1 }
 0x111   :  { %v2454_v11 = vpack.c.bf16 %v377_v63, %v377_v63  ;;  %v2486_v12 = vpack.c.bf16 %v505_v0, %v505_v0  ;;  %v380_v15 = vadd.f32 %v3432_v5, %v379_v8  ;;  %v508_v16 = vadd.f32 %v3432_v5, %v507_v10 }
 0x112   :  { %1442 = vst.msk [vmem:[%s4409_s7 + $0x68] sm:$0xf] %vm1415_vm1, %v2456_v3  ;;  %1474 = vst.msk [vmem:[%s4409_s7 + $0xe8] sm:$0xf] %vm1415_vm1, %v2488_v4  ;;  %v2457_v17 = vpack.c.bf16 %v388_v6, %v388_v6  ;;  %v2489_v18 = vpack.c.bf16 %v516_v7, %v516_v7 }
 0x113   :  { %1440 = vst.msk [vmem:[%s4409_s7 + $0x60] sm:$0xf] %vm1415_vm1, %v2454_v11  ;;  %1472 = vst.msk [vmem:[%s4409_s7 + $0xe0] sm:$0xf] %vm1415_vm1, %v2486_v12  ;;  %v2455_v19 = vpack.c.bf16 %v380_v15, %v380_v15  ;;  %v2487_v22 = vpack.c.bf16 %v508_v16, %v508_v16 }
 0x114   :  { %1443 = vst.msk [vmem:[%s4409_s7 + $0x6c] sm:$0xf] %vm1415_vm1, %v2457_v17  ;;  %1475 = vst.msk [vmem:[%s4409_s7 + $0xec] sm:$0xf] %vm1415_vm1, %v2489_v18 }
 0x115   :  { %1441 = vst.msk [vmem:[%s4409_s7 + $0x64] sm:$0xf] %vm1415_vm1, %v2455_v19  ;;  %1473 = vst.msk [vmem:[%s4409_s7 + $0xe4] sm:$0xf] %vm1415_vm1, %v2487_v22  ;;  %v2758_v23 = vpop.f32.mrb[28].mxu0  ;;  %v2790_v24 = vpop.f32.mrb[28].mxu1 }
 0x116   :  { %v401_v25 = vadd.f32 %v2758_v23, %v3432_v5  ;;  %v529_v26 = vadd.f32 %v2790_v24, %v3432_v5  ;;  %v392_v27 = vpop.f32.mrb[29].mxu0  ;;  %v520_v28 = vpop.f32.mrb[29].mxu1 }
 0x117   :  { %v393_v29 = vadd.f32 %v3432_v5, %v392_v27  ;;  %v521_v34 = vadd.f32 %v3432_v5, %v520_v28  ;;  %v2759_v35 = vpop.f32.mrb[30].mxu0  ;;  %v2791_v36 = vpop.f32.mrb[30].mxu1 }
 0x118   :  { %v2460_v37 = vpack.c.bf16 %v401_v25, %v401_v25  ;;  %v2492_v38 = vpack.c.bf16 %v529_v26, %v529_v26  ;;  %v404_v39 = vadd.f32 %v2759_v35, %v3432_v5  ;;  %v532_v40 = vadd.f32 %v2791_v36, %v3432_v5  ;;  %v395_v41 = vpop.f32.mrb[31].mxu0  ;;  %v523_v42 = vpop.f32.mrb[31].mxu1 }
 0x119   :  { %v2458_v43 = vpack.c.bf16 %v393_v29, %v393_v29  ;;  %v2490_v48 = vpack.c.bf16 %v521_v34, %v521_v34  ;;  %v396_v49 = vadd.f32 %v3432_v5, %v395_v41  ;;  %v524_v50 = vadd.f32 %v3432_v5, %v523_v42 }
 0x11a   :  { %1446 = vst.msk [vmem:[%s4409_s7 + $0x78] sm:$0xf] %vm1415_vm1, %v2460_v37  ;;  %1478 = vst.msk [vmem:[%s4409_s7 + $0xf8] sm:$0xf] %vm1415_vm1, %v2492_v38  ;;  %v2461_v51 = vpack.c.bf16 %v404_v39, %v404_v39  ;;  %v2493_v9 = vpack.c.bf16 %v532_v40, %v532_v40 }
 0x11b   :  { %1444 = vst.msk [vmem:[%s4409_s7 + $0x70] sm:$0xf] %vm1415_vm1, %v2458_v43  ;;  %1476 = vst.msk [vmem:[%s4409_s7 + $0xf0] sm:$0xf] %vm1415_vm1, %v2490_v48  ;;  %v2459_v5 = vpack.c.bf16 %v396_v49, %v396_v49  ;;  %v2491_v13 = vpack.c.bf16 %v524_v50, %v524_v50 }
 0x11c   :  { %1447 = vst.msk [vmem:[%s4409_s7 + $0x7c] sm:$0xf] %vm1415_vm1, %v2461_v51  ;;  %1479 = vst.msk [vmem:[%s4409_s7 + $0xfc] sm:$0xf] %vm1415_vm1, %v2493_v9 }
 0x11d   :  { %1445 = vst.msk [vmem:[%s4409_s7 + $0x74] sm:$0xf] %vm1415_vm1, %v2459_v5  ;;  %1477 = vst.msk [vmem:[%s4409_s7 + $0xf4] sm:$0xf] %vm1415_vm1, %v2491_v13  ;;  %v2798_v21 = vpop.f32.mrb[32].mxu1  ;;  %v2866_v30 = vpop.f32.mrb[32].mxu0 }
 0x11e   :  { %v601_v31 = vadd.f32 %v2798_v21, %v3741_v14  ;;  %v913_v32 = vadd.f32 %v2866_v30, %v3746_v20  ;;  %v592_v33 = vpop.f32.mrb[33].mxu1  ;;  %v904_v44 = vpop.f32.mrb[33].mxu0 }
 0x11f   :  { %v593_v45 = vadd.f32 %v3741_v14, %v592_v33  ;;  %v905_v46 = vadd.f32 %v3746_v20, %v904_v44  ;;  %v2799_v47 = vpop.f32.mrb[34].mxu1  ;;  %v2867_v52 = vpop.f32.mrb[34].mxu0 }
 0x120   :  { %v2496_v53 = vpack.c.bf16 %v601_v31, %v601_v31  ;;  %v2560_v54 = vpack.c.bf16 %v913_v32, %v913_v32  ;;  %v604_v55 = vadd.f32 %v2799_v47, %v3741_v14  ;;  %v916_v56 = vadd.f32 %v2867_v52, %v3746_v20  ;;  %v595_v57 = vpop.f32.mrb[35].mxu1  ;;  %v907_v58 = vpop.f32.mrb[35].mxu0 }
 0x121   :  { %v2494_v59 = vpack.c.bf16 %v593_v45, %v593_v45  ;;  %v2558_v60 = vpack.c.bf16 %v905_v46, %v905_v46  ;;  %v596_v61 = vadd.f32 %v3741_v14, %v595_v57  ;;  %v908_v62 = vadd.f32 %v3746_v20, %v907_v58 }
 0x122   :  { %1738 = vst.msk [vmem:[%s4412_s8 + $0x8] sm:$0xf] %vm1415_vm1, %v2496_v53  ;;  %v2497_v63 = vpack.c.bf16 %v604_v55, %v604_v55  ;;  %v2561_v0 = vpack.c.bf16 %v916_v56, %v916_v56 }
 0x123   :  { %2059 = vst.msk [vmem:[%s4413_s9 + $0x8] sm:$0xf] %vm2056_vm2, %v2560_v54  ;;  %2057 = vst.msk [vmem:[%s4413_s9] sm:$0xf] %vm2056_vm2, %v2558_v60  ;;  %v2495_v1 = vpack.c.bf16 %v596_v61, %v596_v61  ;;  %v2559_v2 = vpack.c.bf16 %v908_v62, %v908_v62 }
 0x124   :  { %1736 = vst.msk [vmem:[%s4412_s8] sm:$0xf] %vm1415_vm1, %v2494_v59  ;;  %1739 = vst.msk [vmem:[%s4412_s8 + $0xc] sm:$0xf] %vm1415_vm1, %v2497_v63 }
 0x125   :  { %2060 = vst.msk [vmem:[%s4413_s9 + $0xc] sm:$0xf] %vm2056_vm2, %v2561_v0  ;;  %2058 = vst.msk [vmem:[%s4413_s9 + $0x4] sm:$0xf] %vm2056_vm2, %v2559_v2  ;;  %v2802_v3 = vpop.f32.mrb[36].mxu1  ;;  %v2870_v4 = vpop.f32.mrb[36].mxu0 }
 0x126   :  { %1737 = vst.msk [vmem:[%s4412_s8 + $0x4] sm:$0xf] %vm1415_vm1, %v2495_v1  ;;  %v617_v6 = vadd.f32 %v2802_v3, %v3741_v14  ;;  %v929_v7 = vadd.f32 %v2870_v4, %v3746_v20  ;;  %v608_v8 = vpop.f32.mrb[37].mxu1  ;;  %v920_v10 = vpop.f32.mrb[37].mxu0 }
 0x127   :  { %v609_v11 = vadd.f32 %v3741_v14, %v608_v8  ;;  %v921_v12 = vadd.f32 %v3746_v20, %v920_v10  ;;  %v2803_v15 = vpop.f32.mrb[38].mxu1  ;;  %v2871_v16 = vpop.f32.mrb[38].mxu0 }
 0x128   :  { %v2500_v17 = vpack.c.bf16 %v617_v6, %v617_v6  ;;  %v2564_v18 = vpack.c.bf16 %v929_v7, %v929_v7  ;;  %v620_v19 = vadd.f32 %v2803_v15, %v3741_v14  ;;  %v932_v22 = vadd.f32 %v2871_v16, %v3746_v20  ;;  %v611_v23 = vpop.f32.mrb[39].mxu1  ;;  %v923_v24 = vpop.f32.mrb[39].mxu0 }
 0x129   :  { %v2498_v25 = vpack.c.bf16 %v609_v11, %v609_v11  ;;  %v2562_v26 = vpack.c.bf16 %v921_v12, %v921_v12  ;;  %v612_v27 = vadd.f32 %v3741_v14, %v611_v23  ;;  %v924_v28 = vadd.f32 %v3746_v20, %v923_v24 }
 0x12a   :  { %1742 = vst.msk [vmem:[%s4412_s8 + $0x18] sm:$0xf] %vm1415_vm1, %v2500_v17  ;;  %v2501_v29 = vpack.c.bf16 %v620_v19, %v620_v19  ;;  %v2565_v34 = vpack.c.bf16 %v932_v22, %v932_v22 }
 0x12b   :  { %2063 = vst.msk [vmem:[%s4413_s9 + $0x18] sm:$0xf] %vm2056_vm2, %v2564_v18  ;;  %2061 = vst.msk [vmem:[%s4413_s9 + $0x10] sm:$0xf] %vm2056_vm2, %v2562_v26  ;;  %v2499_v35 = vpack.c.bf16 %v612_v27, %v612_v27  ;;  %v2563_v36 = vpack.c.bf16 %v924_v28, %v924_v28 }
 0x12c   :  { %1740 = vst.msk [vmem:[%s4412_s8 + $0x10] sm:$0xf] %vm1415_vm1, %v2498_v25  ;;  %1743 = vst.msk [vmem:[%s4412_s8 + $0x1c] sm:$0xf] %vm1415_vm1, %v2501_v29 }
 0x12d   :  { %2064 = vst.msk [vmem:[%s4413_s9 + $0x1c] sm:$0xf] %vm2056_vm2, %v2565_v34  ;;  %2062 = vst.msk [vmem:[%s4413_s9 + $0x14] sm:$0xf] %vm2056_vm2, %v2563_v36  ;;  %v2806_v37 = vpop.f32.mrb[40].mxu1  ;;  %v2874_v38 = vpop.f32.mrb[40].mxu0 }
 0x12e   :  { %1741 = vst.msk [vmem:[%s4412_s8 + $0x14] sm:$0xf] %vm1415_vm1, %v2499_v35  ;;  %v633_v39 = vadd.f32 %v2806_v37, %v3741_v14  ;;  %v945_v40 = vadd.f32 %v2874_v38, %v3746_v20  ;;  %v624_v41 = vpop.f32.mrb[41].mxu1  ;;  %v936_v42 = vpop.f32.mrb[41].mxu0 }
 0x12f   :  { %v625_v43 = vadd.f32 %v3741_v14, %v624_v41  ;;  %v937_v48 = vadd.f32 %v3746_v20, %v936_v42  ;;  %v2807_v49 = vpop.f32.mrb[42].mxu1  ;;  %v2875_v50 = vpop.f32.mrb[42].mxu0 }
 0x130   :  { %v2504_v51 = vpack.c.bf16 %v633_v39, %v633_v39  ;;  %v2568_v9 = vpack.c.bf16 %v945_v40, %v945_v40  ;;  %v636_v5 = vadd.f32 %v2807_v49, %v3741_v14  ;;  %v948_v13 = vadd.f32 %v2875_v50, %v3746_v20  ;;  %v627_v21 = vpop.f32.mrb[43].mxu1  ;;  %v939_v30 = vpop.f32.mrb[43].mxu0 }
 0x131   :  { %v2502_v31 = vpack.c.bf16 %v625_v43, %v625_v43  ;;  %v2566_v32 = vpack.c.bf16 %v937_v48, %v937_v48  ;;  %v628_v33 = vadd.f32 %v3741_v14, %v627_v21  ;;  %v940_v44 = vadd.f32 %v3746_v20, %v939_v30 }
 0x132   :  { %1746 = vst.msk [vmem:[%s4412_s8 + $0x28] sm:$0xf] %vm1415_vm1, %v2504_v51  ;;  %v2505_v45 = vpack.c.bf16 %v636_v5, %v636_v5  ;;  %v2569_v46 = vpack.c.bf16 %v948_v13, %v948_v13 }
 0x133   :  { %2067 = vst.msk [vmem:[%s4413_s9 + $0x28] sm:$0xf] %vm2056_vm2, %v2568_v9  ;;  %2065 = vst.msk [vmem:[%s4413_s9 + $0x20] sm:$0xf] %vm2056_vm2, %v2566_v32  ;;  %v2503_v47 = vpack.c.bf16 %v628_v33, %v628_v33  ;;  %v2567_v52 = vpack.c.bf16 %v940_v44, %v940_v44 }
 0x134   :  { %1744 = vst.msk [vmem:[%s4412_s8 + $0x20] sm:$0xf] %vm1415_vm1, %v2502_v31  ;;  %1747 = vst.msk [vmem:[%s4412_s8 + $0x2c] sm:$0xf] %vm1415_vm1, %v2505_v45 }
 0x135   :  { %2068 = vst.msk [vmem:[%s4413_s9 + $0x2c] sm:$0xf] %vm2056_vm2, %v2569_v46  ;;  %2066 = vst.msk [vmem:[%s4413_s9 + $0x24] sm:$0xf] %vm2056_vm2, %v2567_v52  ;;  %v2810_v53 = vpop.f32.mrb[44].mxu1  ;;  %v2878_v54 = vpop.f32.mrb[44].mxu0 }
 0x136   :  { %1745 = vst.msk [vmem:[%s4412_s8 + $0x24] sm:$0xf] %vm1415_vm1, %v2503_v47  ;;  %v649_v55 = vadd.f32 %v2810_v53, %v3741_v14  ;;  %v961_v56 = vadd.f32 %v2878_v54, %v3746_v20  ;;  %v640_v57 = vpop.f32.mrb[45].mxu1  ;;  %v952_v58 = vpop.f32.mrb[45].mxu0 }
 0x137   :  { %v641_v59 = vadd.f32 %v3741_v14, %v640_v57  ;;  %v953_v60 = vadd.f32 %v3746_v20, %v952_v58  ;;  %v2811_v61 = vpop.f32.mrb[46].mxu1  ;;  %v2879_v62 = vpop.f32.mrb[46].mxu0 }
 0x138   :  { %v2508_v63 = vpack.c.bf16 %v649_v55, %v649_v55  ;;  %v2572_v0 = vpack.c.bf16 %v961_v56, %v961_v56  ;;  %v652_v1 = vadd.f32 %v2811_v61, %v3741_v14  ;;  %v964_v2 = vadd.f32 %v2879_v62, %v3746_v20  ;;  %v643_v3 = vpop.f32.mrb[47].mxu1  ;;  %v955_v4 = vpop.f32.mrb[47].mxu0 }
 0x139   :  { %v2506_v6 = vpack.c.bf16 %v641_v59, %v641_v59  ;;  %v2570_v7 = vpack.c.bf16 %v953_v60, %v953_v60  ;;  %v644_v8 = vadd.f32 %v3741_v14, %v643_v3  ;;  %v956_v10 = vadd.f32 %v3746_v20, %v955_v4 }
 0x13a   :  { %1750 = vst.msk [vmem:[%s4412_s8 + $0x38] sm:$0xf] %vm1415_vm1, %v2508_v63  ;;  %v2509_v11 = vpack.c.bf16 %v652_v1, %v652_v1  ;;  %v2573_v12 = vpack.c.bf16 %v964_v2, %v964_v2 }
 0x13b   :  { %2071 = vst.msk [vmem:[%s4413_s9 + $0x38] sm:$0xf] %vm2056_vm2, %v2572_v0  ;;  %2069 = vst.msk [vmem:[%s4413_s9 + $0x30] sm:$0xf] %vm2056_vm2, %v2570_v7  ;;  %v2507_v15 = vpack.c.bf16 %v644_v8, %v644_v8  ;;  %v2571_v16 = vpack.c.bf16 %v956_v10, %v956_v10 }
 0x13c   :  { %1748 = vst.msk [vmem:[%s4412_s8 + $0x30] sm:$0xf] %vm1415_vm1, %v2506_v6  ;;  %1751 = vst.msk [vmem:[%s4412_s8 + $0x3c] sm:$0xf] %vm1415_vm1, %v2509_v11 }
 0x13d   :  { %2072 = vst.msk [vmem:[%s4413_s9 + $0x3c] sm:$0xf] %vm2056_vm2, %v2573_v12  ;;  %2070 = vst.msk [vmem:[%s4413_s9 + $0x34] sm:$0xf] %vm2056_vm2, %v2571_v16  ;;  %v2814_v17 = vpop.f32.mrb[48].mxu1  ;;  %v2882_v18 = vpop.f32.mrb[48].mxu0 }
 0x13e   :  { %1749 = vst.msk [vmem:[%s4412_s8 + $0x34] sm:$0xf] %vm1415_vm1, %v2507_v15  ;;  %v665_v19 = vadd.f32 %v2814_v17, %v3741_v14  ;;  %v977_v22 = vadd.f32 %v2882_v18, %v3746_v20  ;;  %v656_v23 = vpop.f32.mrb[49].mxu1  ;;  %v968_v24 = vpop.f32.mrb[49].mxu0 }
 0x13f   :  { %v657_v25 = vadd.f32 %v3741_v14, %v656_v23  ;;  %v969_v26 = vadd.f32 %v3746_v20, %v968_v24  ;;  %v2815_v27 = vpop.f32.mrb[50].mxu1  ;;  %v2883_v28 = vpop.f32.mrb[50].mxu0 }
 0x140   :  { %v2512_v29 = vpack.c.bf16 %v665_v19, %v665_v19  ;;  %v2576_v34 = vpack.c.bf16 %v977_v22, %v977_v22  ;;  %v668_v35 = vadd.f32 %v2815_v27, %v3741_v14  ;;  %v980_v36 = vadd.f32 %v2883_v28, %v3746_v20  ;;  %v659_v37 = vpop.f32.mrb[51].mxu1  ;;  %v971_v38 = vpop.f32.mrb[51].mxu0 }
 0x141   :  { %v2510_v39 = vpack.c.bf16 %v657_v25, %v657_v25  ;;  %v2574_v40 = vpack.c.bf16 %v969_v26, %v969_v26  ;;  %v660_v41 = vadd.f32 %v3741_v14, %v659_v37  ;;  %v972_v42 = vadd.f32 %v3746_v20, %v971_v38 }
 0x142   :  { %1754 = vst.msk [vmem:[%s4412_s8 + $0x48] sm:$0xf] %vm1415_vm1, %v2512_v29  ;;  %v2513_v43 = vpack.c.bf16 %v668_v35, %v668_v35  ;;  %v2577_v48 = vpack.c.bf16 %v980_v36, %v980_v36 }
 0x143   :  { %2075 = vst.msk [vmem:[%s4413_s9 + $0x48] sm:$0xf] %vm2056_vm2, %v2576_v34  ;;  %2073 = vst.msk [vmem:[%s4413_s9 + $0x40] sm:$0xf] %vm2056_vm2, %v2574_v40  ;;  %v2511_v49 = vpack.c.bf16 %v660_v41, %v660_v41  ;;  %v2575_v50 = vpack.c.bf16 %v972_v42, %v972_v42 }
 0x144   :  { %1752 = vst.msk [vmem:[%s4412_s8 + $0x40] sm:$0xf] %vm1415_vm1, %v2510_v39  ;;  %1755 = vst.msk [vmem:[%s4412_s8 + $0x4c] sm:$0xf] %vm1415_vm1, %v2513_v43 }
 0x145   :  { %2076 = vst.msk [vmem:[%s4413_s9 + $0x4c] sm:$0xf] %vm2056_vm2, %v2577_v48  ;;  %2074 = vst.msk [vmem:[%s4413_s9 + $0x44] sm:$0xf] %vm2056_vm2, %v2575_v50  ;;  %v2818_v51 = vpop.f32.mrb[52].mxu1  ;;  %v2886_v9 = vpop.f32.mrb[52].mxu0 }
 0x146   :  { %1753 = vst.msk [vmem:[%s4412_s8 + $0x44] sm:$0xf] %vm1415_vm1, %v2511_v49  ;;  %v681_v5 = vadd.f32 %v2818_v51, %v3741_v14  ;;  %v993_v13 = vadd.f32 %v2886_v9, %v3746_v20  ;;  %v672_v21 = vpop.f32.mrb[53].mxu1  ;;  %v984_v30 = vpop.f32.mrb[53].mxu0 }
 0x147   :  { %v673_v31 = vadd.f32 %v3741_v14, %v672_v21  ;;  %v985_v32 = vadd.f32 %v3746_v20, %v984_v30  ;;  %v2819_v33 = vpop.f32.mrb[54].mxu1  ;;  %v2887_v44 = vpop.f32.mrb[54].mxu0 }
 0x148   :  { %v2516_v45 = vpack.c.bf16 %v681_v5, %v681_v5  ;;  %v2580_v46 = vpack.c.bf16 %v993_v13, %v993_v13  ;;  %v684_v47 = vadd.f32 %v2819_v33, %v3741_v14  ;;  %v996_v52 = vadd.f32 %v2887_v44, %v3746_v20  ;;  %v675_v53 = vpop.f32.mrb[55].mxu1  ;;  %v987_v54 = vpop.f32.mrb[55].mxu0 }
 0x149   :  { %v2514_v55 = vpack.c.bf16 %v673_v31, %v673_v31  ;;  %v2578_v56 = vpack.c.bf16 %v985_v32, %v985_v32  ;;  %v676_v57 = vadd.f32 %v3741_v14, %v675_v53  ;;  %v988_v58 = vadd.f32 %v3746_v20, %v987_v54 }
 0x14a   :  { %1758 = vst.msk [vmem:[%s4412_s8 + $0x58] sm:$0xf] %vm1415_vm1, %v2516_v45  ;;  %v2517_v59 = vpack.c.bf16 %v684_v47, %v684_v47  ;;  %v2581_v60 = vpack.c.bf16 %v996_v52, %v996_v52 }
 0x14b   :  { %2079 = vst.msk [vmem:[%s4413_s9 + $0x58] sm:$0xf] %vm2056_vm2, %v2580_v46  ;;  %2077 = vst.msk [vmem:[%s4413_s9 + $0x50] sm:$0xf] %vm2056_vm2, %v2578_v56  ;;  %v2515_v61 = vpack.c.bf16 %v676_v57, %v676_v57  ;;  %v2579_v62 = vpack.c.bf16 %v988_v58, %v988_v58 }
 0x14c   :  { %1756 = vst.msk [vmem:[%s4412_s8 + $0x50] sm:$0xf] %vm1415_vm1, %v2514_v55  ;;  %1759 = vst.msk [vmem:[%s4412_s8 + $0x5c] sm:$0xf] %vm1415_vm1, %v2517_v59 }
 0x14d   :  { %2080 = vst.msk [vmem:[%s4413_s9 + $0x5c] sm:$0xf] %vm2056_vm2, %v2581_v60  ;;  %2078 = vst.msk [vmem:[%s4413_s9 + $0x54] sm:$0xf] %vm2056_vm2, %v2579_v62  ;;  %v2822_v63 = vpop.f32.mrb[56].mxu1  ;;  %v2890_v0 = vpop.f32.mrb[56].mxu0 }
 0x14e   :  { %1757 = vst.msk [vmem:[%s4412_s8 + $0x54] sm:$0xf] %vm1415_vm1, %v2515_v61  ;;  %v697_v1 = vadd.f32 %v2822_v63, %v3741_v14  ;;  %v1009_v2 = vadd.f32 %v2890_v0, %v3746_v20  ;;  %v688_v3 = vpop.f32.mrb[57].mxu1  ;;  %v1000_v4 = vpop.f32.mrb[57].mxu0 }
 0x14f   :  { %v689_v6 = vadd.f32 %v3741_v14, %v688_v3  ;;  %v1001_v7 = vadd.f32 %v3746_v20, %v1000_v4  ;;  %v2823_v8 = vpop.f32.mrb[58].mxu1  ;;  %v2891_v10 = vpop.f32.mrb[58].mxu0 }
 0x150   :  { %v2520_v11 = vpack.c.bf16 %v697_v1, %v697_v1  ;;  %v2584_v12 = vpack.c.bf16 %v1009_v2, %v1009_v2  ;;  %v700_v15 = vadd.f32 %v2823_v8, %v3741_v14  ;;  %v1012_v16 = vadd.f32 %v2891_v10, %v3746_v20  ;;  %v691_v17 = vpop.f32.mrb[59].mxu1  ;;  %v1003_v18 = vpop.f32.mrb[59].mxu0 }
 0x151   :  { %v2518_v19 = vpack.c.bf16 %v689_v6, %v689_v6  ;;  %v2582_v22 = vpack.c.bf16 %v1001_v7, %v1001_v7  ;;  %v692_v23 = vadd.f32 %v3741_v14, %v691_v17  ;;  %v1004_v24 = vadd.f32 %v3746_v20, %v1003_v18 }
 0x152   :  { %1762 = vst.msk [vmem:[%s4412_s8 + $0x68] sm:$0xf] %vm1415_vm1, %v2520_v11  ;;  %v2521_v25 = vpack.c.bf16 %v700_v15, %v700_v15  ;;  %v2585_v26 = vpack.c.bf16 %v1012_v16, %v1012_v16 }
 0x153   :  { %2083 = vst.msk [vmem:[%s4413_s9 + $0x68] sm:$0xf] %vm2056_vm2, %v2584_v12  ;;  %2081 = vst.msk [vmem:[%s4413_s9 + $0x60] sm:$0xf] %vm2056_vm2, %v2582_v22  ;;  %v2519_v27 = vpack.c.bf16 %v692_v23, %v692_v23  ;;  %v2583_v28 = vpack.c.bf16 %v1004_v24, %v1004_v24 }
 0x154   :  { %1760 = vst.msk [vmem:[%s4412_s8 + $0x60] sm:$0xf] %vm1415_vm1, %v2518_v19  ;;  %1763 = vst.msk [vmem:[%s4412_s8 + $0x6c] sm:$0xf] %vm1415_vm1, %v2521_v25 }
 0x155   :  { %2084 = vst.msk [vmem:[%s4413_s9 + $0x6c] sm:$0xf] %vm2056_vm2, %v2585_v26  ;;  %2082 = vst.msk [vmem:[%s4413_s9 + $0x64] sm:$0xf] %vm2056_vm2, %v2583_v28  ;;  %v2826_v29 = vpop.f32.mrb[60].mxu1  ;;  %v2894_v34 = vpop.f32.mrb[60].mxu0 }
 0x156   :  { %1761 = vst.msk [vmem:[%s4412_s8 + $0x64] sm:$0xf] %vm1415_vm1, %v2519_v27  ;;  %v713_v35 = vadd.f32 %v2826_v29, %v3741_v14  ;;  %v1025_v36 = vadd.f32 %v2894_v34, %v3746_v20  ;;  %v704_v37 = vpop.f32.mrb[61].mxu1  ;;  %v1016_v38 = vpop.f32.mrb[61].mxu0 }
 0x157   :  { %v705_v39 = vadd.f32 %v3741_v14, %v704_v37  ;;  %v1017_v40 = vadd.f32 %v3746_v20, %v1016_v38  ;;  %v2827_v41 = vpop.f32.mrb[62].mxu1  ;;  %v2895_v42 = vpop.f32.mrb[62].mxu0 }
 0x158   :  { %v2524_v43 = vpack.c.bf16 %v713_v35, %v713_v35  ;;  %v2588_v48 = vpack.c.bf16 %v1025_v36, %v1025_v36  ;;  %v716_v49 = vadd.f32 %v2827_v41, %v3741_v14  ;;  %v1028_v50 = vadd.f32 %v2895_v42, %v3746_v20  ;;  %v707_v51 = vpop.f32.mrb[63].mxu1  ;;  %v1019_v9 = vpop.f32.mrb[63].mxu0 }
 0x159   :  { %v2522_v5 = vpack.c.bf16 %v705_v39, %v705_v39  ;;  %v2586_v13 = vpack.c.bf16 %v1017_v40, %v1017_v40  ;;  %v708_v21 = vadd.f32 %v3741_v14, %v707_v51  ;;  %v1020_v30 = vadd.f32 %v3746_v20, %v1019_v9 }
 0x15a   :  { %1766 = vst.msk [vmem:[%s4412_s8 + $0x78] sm:$0xf] %vm1415_vm1, %v2524_v43  ;;  %v2525_v31 = vpack.c.bf16 %v716_v49, %v716_v49  ;;  %v2589_v32 = vpack.c.bf16 %v1028_v50, %v1028_v50 }
 0x15b   :  { %2087 = vst.msk [vmem:[%s4413_s9 + $0x78] sm:$0xf] %vm2056_vm2, %v2588_v48  ;;  %2085 = vst.msk [vmem:[%s4413_s9 + $0x70] sm:$0xf] %vm2056_vm2, %v2586_v13  ;;  %v2523_v33 = vpack.c.bf16 %v708_v21, %v708_v21  ;;  %v2587_v44 = vpack.c.bf16 %v1020_v30, %v1020_v30 }
 0x15c   :  { %1764 = vst.msk [vmem:[%s4412_s8 + $0x70] sm:$0xf] %vm1415_vm1, %v2522_v5  ;;  %1767 = vst.msk [vmem:[%s4412_s8 + $0x7c] sm:$0xf] %vm1415_vm1, %v2525_v31 }
 0x15d   :  { %2088 = vst.msk [vmem:[%s4413_s9 + $0x7c] sm:$0xf] %vm2056_vm2, %v2589_v32  ;;  %2086 = vst.msk [vmem:[%s4413_s9 + $0x74] sm:$0xf] %vm2056_vm2, %v2587_v44  ;;  %v2830_v45 = vpop.f32.mrb[64].mxu1  ;;  %v2898_v46 = vpop.f32.mrb[64].mxu0 }
 0x15e   :  { %1765 = vst.msk [vmem:[%s4412_s8 + $0x74] sm:$0xf] %vm1415_vm1, %v2523_v33  ;;  %v729_v47 = vadd.f32 %v2830_v45, %v3741_v14  ;;  %v1041_v52 = vadd.f32 %v2898_v46, %v3746_v20  ;;  %v720_v53 = vpop.f32.mrb[65].mxu1  ;;  %v1032_v54 = vpop.f32.mrb[65].mxu0 }
 0x15f   :  { %v721_v55 = vadd.f32 %v3741_v14, %v720_v53  ;;  %v1033_v56 = vadd.f32 %v3746_v20, %v1032_v54  ;;  %v2831_v57 = vpop.f32.mrb[66].mxu1  ;;  %v2899_v58 = vpop.f32.mrb[66].mxu0 }
 0x160   :  { %v2528_v59 = vpack.c.bf16 %v729_v47, %v729_v47  ;;  %v2592_v60 = vpack.c.bf16 %v1041_v52, %v1041_v52  ;;  %v732_v61 = vadd.f32 %v2831_v57, %v3741_v14  ;;  %v1044_v62 = vadd.f32 %v2899_v58, %v3746_v20  ;;  %v723_v63 = vpop.f32.mrb[67].mxu1  ;;  %v1035_v0 = vpop.f32.mrb[67].mxu0 }
 0x161   :  { %v2526_v1 = vpack.c.bf16 %v721_v55, %v721_v55  ;;  %v2590_v2 = vpack.c.bf16 %v1033_v56, %v1033_v56  ;;  %v724_v3 = vadd.f32 %v3741_v14, %v723_v63  ;;  %v1036_v4 = vadd.f32 %v3746_v20, %v1035_v0 }
 0x162   :  { %1770 = vst.msk [vmem:[%s4412_s8 + $0x88] sm:$0xf] %vm1415_vm1, %v2528_v59  ;;  %v2529_v6 = vpack.c.bf16 %v732_v61, %v732_v61  ;;  %v2593_v7 = vpack.c.bf16 %v1044_v62, %v1044_v62 }
 0x163   :  { %2091 = vst.msk [vmem:[%s4413_s9 + $0x88] sm:$0xf] %vm2056_vm2, %v2592_v60  ;;  %2089 = vst.msk [vmem:[%s4413_s9 + $0x80] sm:$0xf] %vm2056_vm2, %v2590_v2  ;;  %v2527_v8 = vpack.c.bf16 %v724_v3, %v724_v3  ;;  %v2591_v10 = vpack.c.bf16 %v1036_v4, %v1036_v4 }
 0x164   :  { %1768 = vst.msk [vmem:[%s4412_s8 + $0x80] sm:$0xf] %vm1415_vm1, %v2526_v1  ;;  %1771 = vst.msk [vmem:[%s4412_s8 + $0x8c] sm:$0xf] %vm1415_vm1, %v2529_v6 }
 0x165   :  { %2092 = vst.msk [vmem:[%s4413_s9 + $0x8c] sm:$0xf] %vm2056_vm2, %v2593_v7  ;;  %2090 = vst.msk [vmem:[%s4413_s9 + $0x84] sm:$0xf] %vm2056_vm2, %v2591_v10  ;;  %v2834_v11 = vpop.f32.mrb[68].mxu1  ;;  %v2902_v12 = vpop.f32.mrb[68].mxu0 }
 0x166   :  { %1769 = vst.msk [vmem:[%s4412_s8 + $0x84] sm:$0xf] %vm1415_vm1, %v2527_v8  ;;  %v745_v15 = vadd.f32 %v2834_v11, %v3741_v14  ;;  %v1057_v16 = vadd.f32 %v2902_v12, %v3746_v20  ;;  %v736_v17 = vpop.f32.mrb[69].mxu1  ;;  %v1048_v18 = vpop.f32.mrb[69].mxu0 }
 0x167   :  { %v737_v19 = vadd.f32 %v3741_v14, %v736_v17  ;;  %v1049_v22 = vadd.f32 %v3746_v20, %v1048_v18  ;;  %v2835_v23 = vpop.f32.mrb[70].mxu1  ;;  %v2903_v24 = vpop.f32.mrb[70].mxu0 }
 0x168   :  { %v2532_v25 = vpack.c.bf16 %v745_v15, %v745_v15  ;;  %v2596_v26 = vpack.c.bf16 %v1057_v16, %v1057_v16  ;;  %v748_v27 = vadd.f32 %v2835_v23, %v3741_v14  ;;  %v1060_v28 = vadd.f32 %v2903_v24, %v3746_v20  ;;  %v739_v29 = vpop.f32.mrb[71].mxu1  ;;  %v1051_v34 = vpop.f32.mrb[71].mxu0 }
 0x169   :  { %v2530_v35 = vpack.c.bf16 %v737_v19, %v737_v19  ;;  %v2594_v36 = vpack.c.bf16 %v1049_v22, %v1049_v22  ;;  %v740_v37 = vadd.f32 %v3741_v14, %v739_v29  ;;  %v1052_v38 = vadd.f32 %v3746_v20, %v1051_v34 }
 0x16a   :  { %1774 = vst.msk [vmem:[%s4412_s8 + $0x98] sm:$0xf] %vm1415_vm1, %v2532_v25  ;;  %v2533_v39 = vpack.c.bf16 %v748_v27, %v748_v27  ;;  %v2597_v40 = vpack.c.bf16 %v1060_v28, %v1060_v28 }
 0x16b   :  { %2095 = vst.msk [vmem:[%s4413_s9 + $0x98] sm:$0xf] %vm2056_vm2, %v2596_v26  ;;  %2093 = vst.msk [vmem:[%s4413_s9 + $0x90] sm:$0xf] %vm2056_vm2, %v2594_v36  ;;  %v2531_v41 = vpack.c.bf16 %v740_v37, %v740_v37  ;;  %v2595_v42 = vpack.c.bf16 %v1052_v38, %v1052_v38 }
 0x16c   :  { %1772 = vst.msk [vmem:[%s4412_s8 + $0x90] sm:$0xf] %vm1415_vm1, %v2530_v35  ;;  %1775 = vst.msk [vmem:[%s4412_s8 + $0x9c] sm:$0xf] %vm1415_vm1, %v2533_v39 }
 0x16d   :  { %2096 = vst.msk [vmem:[%s4413_s9 + $0x9c] sm:$0xf] %vm2056_vm2, %v2597_v40  ;;  %2094 = vst.msk [vmem:[%s4413_s9 + $0x94] sm:$0xf] %vm2056_vm2, %v2595_v42  ;;  %v2838_v43 = vpop.f32.mrb[72].mxu1  ;;  %v2906_v48 = vpop.f32.mrb[72].mxu0 }
 0x16e   :  { %1773 = vst.msk [vmem:[%s4412_s8 + $0x94] sm:$0xf] %vm1415_vm1, %v2531_v41  ;;  %v761_v49 = vadd.f32 %v2838_v43, %v3741_v14  ;;  %v1073_v50 = vadd.f32 %v2906_v48, %v3746_v20  ;;  %v752_v51 = vpop.f32.mrb[73].mxu1  ;;  %v1064_v9 = vpop.f32.mrb[73].mxu0 }
 0x16f   :  { %v753_v5 = vadd.f32 %v3741_v14, %v752_v51  ;;  %v1065_v13 = vadd.f32 %v3746_v20, %v1064_v9  ;;  %v2839_v21 = vpop.f32.mrb[74].mxu1  ;;  %v2907_v30 = vpop.f32.mrb[74].mxu0 }
 0x170   :  { %v2536_v31 = vpack.c.bf16 %v761_v49, %v761_v49  ;;  %v2600_v32 = vpack.c.bf16 %v1073_v50, %v1073_v50  ;;  %v764_v33 = vadd.f32 %v2839_v21, %v3741_v14  ;;  %v1076_v44 = vadd.f32 %v2907_v30, %v3746_v20  ;;  %v755_v45 = vpop.f32.mrb[75].mxu1  ;;  %v1067_v46 = vpop.f32.mrb[75].mxu0 }
 0x171   :  { %v2534_v47 = vpack.c.bf16 %v753_v5, %v753_v5  ;;  %v2598_v52 = vpack.c.bf16 %v1065_v13, %v1065_v13  ;;  %v756_v53 = vadd.f32 %v3741_v14, %v755_v45  ;;  %v1068_v54 = vadd.f32 %v3746_v20, %v1067_v46 }
 0x172   :  { %1778 = vst.msk [vmem:[%s4412_s8 + $0xa8] sm:$0xf] %vm1415_vm1, %v2536_v31  ;;  %v2537_v55 = vpack.c.bf16 %v764_v33, %v764_v33  ;;  %v2601_v56 = vpack.c.bf16 %v1076_v44, %v1076_v44 }
 0x173   :  { %2099 = vst.msk [vmem:[%s4413_s9 + $0xa8] sm:$0xf] %vm2056_vm2, %v2600_v32  ;;  %2097 = vst.msk [vmem:[%s4413_s9 + $0xa0] sm:$0xf] %vm2056_vm2, %v2598_v52  ;;  %v2535_v57 = vpack.c.bf16 %v756_v53, %v756_v53  ;;  %v2599_v58 = vpack.c.bf16 %v1068_v54, %v1068_v54 }
 0x174   :  { %1776 = vst.msk [vmem:[%s4412_s8 + $0xa0] sm:$0xf] %vm1415_vm1, %v2534_v47  ;;  %1779 = vst.msk [vmem:[%s4412_s8 + $0xac] sm:$0xf] %vm1415_vm1, %v2537_v55 }
 0x175   :  { %2100 = vst.msk [vmem:[%s4413_s9 + $0xac] sm:$0xf] %vm2056_vm2, %v2601_v56  ;;  %2098 = vst.msk [vmem:[%s4413_s9 + $0xa4] sm:$0xf] %vm2056_vm2, %v2599_v58  ;;  %v2842_v59 = vpop.f32.mrb[76].mxu1  ;;  %v2910_v60 = vpop.f32.mrb[76].mxu0 }
 0x176   :  { %1777 = vst.msk [vmem:[%s4412_s8 + $0xa4] sm:$0xf] %vm1415_vm1, %v2535_v57  ;;  %v777_v61 = vadd.f32 %v2842_v59, %v3741_v14  ;;  %v1089_v62 = vadd.f32 %v2910_v60, %v3746_v20  ;;  %v768_v63 = vpop.f32.mrb[77].mxu1  ;;  %v1080_v0 = vpop.f32.mrb[77].mxu0 }
 0x177   :  { %v769_v1 = vadd.f32 %v3741_v14, %v768_v63  ;;  %v1081_v2 = vadd.f32 %v3746_v20, %v1080_v0  ;;  %v2843_v3 = vpop.f32.mrb[78].mxu1  ;;  %v2911_v4 = vpop.f32.mrb[78].mxu0 }
 0x178   :  { %v2540_v6 = vpack.c.bf16 %v777_v61, %v777_v61  ;;  %v2604_v7 = vpack.c.bf16 %v1089_v62, %v1089_v62  ;;  %v780_v8 = vadd.f32 %v2843_v3, %v3741_v14  ;;  %v1092_v10 = vadd.f32 %v2911_v4, %v3746_v20  ;;  %v771_v11 = vpop.f32.mrb[79].mxu1  ;;  %v1083_v12 = vpop.f32.mrb[79].mxu0 }
 0x179   :  { %v2538_v15 = vpack.c.bf16 %v769_v1, %v769_v1  ;;  %v2602_v16 = vpack.c.bf16 %v1081_v2, %v1081_v2  ;;  %v772_v17 = vadd.f32 %v3741_v14, %v771_v11  ;;  %v1084_v18 = vadd.f32 %v3746_v20, %v1083_v12 }
 0x17a   :  { %1782 = vst.msk [vmem:[%s4412_s8 + $0xb8] sm:$0xf] %vm1415_vm1, %v2540_v6  ;;  %v2541_v19 = vpack.c.bf16 %v780_v8, %v780_v8  ;;  %v2605_v22 = vpack.c.bf16 %v1092_v10, %v1092_v10 }
 0x17b   :  { %2103 = vst.msk [vmem:[%s4413_s9 + $0xb8] sm:$0xf] %vm2056_vm2, %v2604_v7  ;;  %2101 = vst.msk [vmem:[%s4413_s9 + $0xb0] sm:$0xf] %vm2056_vm2, %v2602_v16  ;;  %v2539_v23 = vpack.c.bf16 %v772_v17, %v772_v17  ;;  %v2603_v24 = vpack.c.bf16 %v1084_v18, %v1084_v18 }
 0x17c   :  { %1780 = vst.msk [vmem:[%s4412_s8 + $0xb0] sm:$0xf] %vm1415_vm1, %v2538_v15  ;;  %1783 = vst.msk [vmem:[%s4412_s8 + $0xbc] sm:$0xf] %vm1415_vm1, %v2541_v19 }
 0x17d   :  { %2104 = vst.msk [vmem:[%s4413_s9 + $0xbc] sm:$0xf] %vm2056_vm2, %v2605_v22  ;;  %2102 = vst.msk [vmem:[%s4413_s9 + $0xb4] sm:$0xf] %vm2056_vm2, %v2603_v24  ;;  %v2846_v25 = vpop.f32.mrb[80].mxu1  ;;  %v2914_v26 = vpop.f32.mrb[80].mxu0 }
 0x17e   :  { %1781 = vst.msk [vmem:[%s4412_s8 + $0xb4] sm:$0xf] %vm1415_vm1, %v2539_v23  ;;  %v793_v27 = vadd.f32 %v2846_v25, %v3741_v14  ;;  %v1105_v28 = vadd.f32 %v2914_v26, %v3746_v20  ;;  %v784_v29 = vpop.f32.mrb[81].mxu1  ;;  %v1096_v34 = vpop.f32.mrb[81].mxu0 }
 0x17f   :  { %v785_v35 = vadd.f32 %v3741_v14, %v784_v29  ;;  %v1097_v36 = vadd.f32 %v3746_v20, %v1096_v34  ;;  %v2847_v37 = vpop.f32.mrb[82].mxu1  ;;  %v2915_v38 = vpop.f32.mrb[82].mxu0 }
 0x180   :  { %v2544_v39 = vpack.c.bf16 %v793_v27, %v793_v27  ;;  %v2608_v40 = vpack.c.bf16 %v1105_v28, %v1105_v28  ;;  %v796_v41 = vadd.f32 %v2847_v37, %v3741_v14  ;;  %v1108_v42 = vadd.f32 %v2915_v38, %v3746_v20  ;;  %v787_v43 = vpop.f32.mrb[83].mxu1  ;;  %v1099_v48 = vpop.f32.mrb[83].mxu0 }
 0x181   :  { %v2542_v49 = vpack.c.bf16 %v785_v35, %v785_v35  ;;  %v2606_v50 = vpack.c.bf16 %v1097_v36, %v1097_v36  ;;  %v788_v51 = vadd.f32 %v3741_v14, %v787_v43  ;;  %v1100_v9 = vadd.f32 %v3746_v20, %v1099_v48 }
 0x182   :  { %1786 = vst.msk [vmem:[%s4412_s8 + $0xc8] sm:$0xf] %vm1415_vm1, %v2544_v39  ;;  %v2545_v5 = vpack.c.bf16 %v796_v41, %v796_v41  ;;  %v2609_v13 = vpack.c.bf16 %v1108_v42, %v1108_v42 }
 0x183   :  { %2107 = vst.msk [vmem:[%s4413_s9 + $0xc8] sm:$0xf] %vm2056_vm2, %v2608_v40  ;;  %2105 = vst.msk [vmem:[%s4413_s9 + $0xc0] sm:$0xf] %vm2056_vm2, %v2606_v50  ;;  %v2543_v21 = vpack.c.bf16 %v788_v51, %v788_v51  ;;  %v2607_v30 = vpack.c.bf16 %v1100_v9, %v1100_v9 }
 0x184   :  { %1784 = vst.msk [vmem:[%s4412_s8 + $0xc0] sm:$0xf] %vm1415_vm1, %v2542_v49  ;;  %1787 = vst.msk [vmem:[%s4412_s8 + $0xcc] sm:$0xf] %vm1415_vm1, %v2545_v5 }
 0x185   :  { %2108 = vst.msk [vmem:[%s4413_s9 + $0xcc] sm:$0xf] %vm2056_vm2, %v2609_v13  ;;  %2106 = vst.msk [vmem:[%s4413_s9 + $0xc4] sm:$0xf] %vm2056_vm2, %v2607_v30  ;;  %v2850_v31 = vpop.f32.mrb[84].mxu1  ;;  %v2918_v32 = vpop.f32.mrb[84].mxu0 }
 0x186   :  { %1785 = vst.msk [vmem:[%s4412_s8 + $0xc4] sm:$0xf] %vm1415_vm1, %v2543_v21  ;;  %v809_v33 = vadd.f32 %v2850_v31, %v3741_v14  ;;  %v1121_v44 = vadd.f32 %v2918_v32, %v3746_v20  ;;  %v800_v45 = vpop.f32.mrb[85].mxu1  ;;  %v1112_v46 = vpop.f32.mrb[85].mxu0 }
 0x187   :  { %v801_v47 = vadd.f32 %v3741_v14, %v800_v45  ;;  %v1113_v52 = vadd.f32 %v3746_v20, %v1112_v46  ;;  %v2851_v53 = vpop.f32.mrb[86].mxu1  ;;  %v2919_v54 = vpop.f32.mrb[86].mxu0 }
 0x188   :  { %v2548_v55 = vpack.c.bf16 %v809_v33, %v809_v33  ;;  %v2612_v56 = vpack.c.bf16 %v1121_v44, %v1121_v44  ;;  %v812_v57 = vadd.f32 %v2851_v53, %v3741_v14  ;;  %v1124_v58 = vadd.f32 %v2919_v54, %v3746_v20  ;;  %v803_v59 = vpop.f32.mrb[87].mxu1  ;;  %v1115_v60 = vpop.f32.mrb[87].mxu0 }
 0x189   :  { %v2546_v61 = vpack.c.bf16 %v801_v47, %v801_v47  ;;  %v2610_v62 = vpack.c.bf16 %v1113_v52, %v1113_v52  ;;  %v804_v63 = vadd.f32 %v3741_v14, %v803_v59  ;;  %v1116_v0 = vadd.f32 %v3746_v20, %v1115_v60 }
 0x18a   :  { %1790 = vst.msk [vmem:[%s4412_s8 + $0xd8] sm:$0xf] %vm1415_vm1, %v2548_v55  ;;  %v2549_v1 = vpack.c.bf16 %v812_v57, %v812_v57  ;;  %v2613_v2 = vpack.c.bf16 %v1124_v58, %v1124_v58 }
 0x18b   :  { %2111 = vst.msk [vmem:[%s4413_s9 + $0xd8] sm:$0xf] %vm2056_vm2, %v2612_v56  ;;  %2109 = vst.msk [vmem:[%s4413_s9 + $0xd0] sm:$0xf] %vm2056_vm2, %v2610_v62  ;;  %v2547_v3 = vpack.c.bf16 %v804_v63, %v804_v63  ;;  %v2611_v4 = vpack.c.bf16 %v1116_v0, %v1116_v0 }
 0x18c   :  { %1788 = vst.msk [vmem:[%s4412_s8 + $0xd0] sm:$0xf] %vm1415_vm1, %v2546_v61  ;;  %1791 = vst.msk [vmem:[%s4412_s8 + $0xdc] sm:$0xf] %vm1415_vm1, %v2549_v1 }
 0x18d   :  { %2112 = vst.msk [vmem:[%s4413_s9 + $0xdc] sm:$0xf] %vm2056_vm2, %v2613_v2  ;;  %2110 = vst.msk [vmem:[%s4413_s9 + $0xd4] sm:$0xf] %vm2056_vm2, %v2611_v4  ;;  %v2854_v6 = vpop.f32.mrb[88].mxu1  ;;  %v2922_v7 = vpop.f32.mrb[88].mxu0 }
 0x18e   :  { %1789 = vst.msk [vmem:[%s4412_s8 + $0xd4] sm:$0xf] %vm1415_vm1, %v2547_v3  ;;  %v825_v8 = vadd.f32 %v2854_v6, %v3741_v14  ;;  %v1137_v10 = vadd.f32 %v2922_v7, %v3746_v20  ;;  %v816_v11 = vpop.f32.mrb[89].mxu1  ;;  %v1128_v12 = vpop.f32.mrb[89].mxu0 }
 0x18f   :  { %v817_v15 = vadd.f32 %v3741_v14, %v816_v11  ;;  %v1129_v16 = vadd.f32 %v3746_v20, %v1128_v12  ;;  %v2855_v17 = vpop.f32.mrb[90].mxu1  ;;  %v2923_v18 = vpop.f32.mrb[90].mxu0 }
 0x190   :  { %v2552_v19 = vpack.c.bf16 %v825_v8, %v825_v8  ;;  %v2616_v22 = vpack.c.bf16 %v1137_v10, %v1137_v10  ;;  %v828_v23 = vadd.f32 %v2855_v17, %v3741_v14  ;;  %v1140_v24 = vadd.f32 %v2923_v18, %v3746_v20  ;;  %v819_v25 = vpop.f32.mrb[91].mxu1  ;;  %v1131_v26 = vpop.f32.mrb[91].mxu0 }
 0x191   :  { %v2550_v27 = vpack.c.bf16 %v817_v15, %v817_v15  ;;  %v2614_v28 = vpack.c.bf16 %v1129_v16, %v1129_v16  ;;  %v820_v29 = vadd.f32 %v3741_v14, %v819_v25  ;;  %v1132_v34 = vadd.f32 %v3746_v20, %v1131_v26 }
 0x192   :  { %1794 = vst.msk [vmem:[%s4412_s8 + $0xe8] sm:$0xf] %vm1415_vm1, %v2552_v19  ;;  %v2553_v35 = vpack.c.bf16 %v828_v23, %v828_v23  ;;  %v2617_v36 = vpack.c.bf16 %v1140_v24, %v1140_v24 }
 0x193   :  { %2115 = vst.msk [vmem:[%s4413_s9 + $0xe8] sm:$0xf] %vm2056_vm2, %v2616_v22  ;;  %2113 = vst.msk [vmem:[%s4413_s9 + $0xe0] sm:$0xf] %vm2056_vm2, %v2614_v28  ;;  %v2551_v37 = vpack.c.bf16 %v820_v29, %v820_v29  ;;  %v2615_v38 = vpack.c.bf16 %v1132_v34, %v1132_v34 }
 0x194   :  { %1792 = vst.msk [vmem:[%s4412_s8 + $0xe0] sm:$0xf] %vm1415_vm1, %v2550_v27  ;;  %1795 = vst.msk [vmem:[%s4412_s8 + $0xec] sm:$0xf] %vm1415_vm1, %v2553_v35 }
 0x195   :  { %2116 = vst.msk [vmem:[%s4413_s9 + $0xec] sm:$0xf] %vm2056_vm2, %v2617_v36  ;;  %2114 = vst.msk [vmem:[%s4413_s9 + $0xe4] sm:$0xf] %vm2056_vm2, %v2615_v38  ;;  %v2858_v39 = vpop.f32.mrb[92].mxu1  ;;  %v2926_v40 = vpop.f32.mrb[92].mxu0 }
 0x196   :  { %1793 = vst.msk [vmem:[%s4412_s8 + $0xe4] sm:$0xf] %vm1415_vm1, %v2551_v37  ;;  %v841_v41 = vadd.f32 %v2858_v39, %v3741_v14  ;;  %v1153_v42 = vadd.f32 %v2926_v40, %v3746_v20  ;;  %v832_v43 = vpop.f32.mrb[93].mxu1  ;;  %v1144_v48 = vpop.f32.mrb[93].mxu0 }
 0x197   :  { %v833_v49 = vadd.f32 %v3741_v14, %v832_v43  ;;  %v1145_v50 = vadd.f32 %v3746_v20, %v1144_v48  ;;  %v2859_v51 = vpop.f32.mrb[94].mxu1  ;;  %v2927_v9 = vpop.f32.mrb[94].mxu0 }
 0x198   :  { %v2556_v5 = vpack.c.bf16 %v841_v41, %v841_v41  ;;  %v2620_v13 = vpack.c.bf16 %v1153_v42, %v1153_v42  ;;  %v844_v21 = vadd.f32 %v2859_v51, %v3741_v14  ;;  %v1156_v30 = vadd.f32 %v2927_v9, %v3746_v20  ;;  %v835_v31 = vpop.f32.mrb[95].mxu1  ;;  %v1147_v32 = vpop.f32.mrb[95].mxu0 }
 0x199   :  { %v2554_v33 = vpack.c.bf16 %v833_v49, %v833_v49  ;;  %v2618_v44 = vpack.c.bf16 %v1145_v50, %v1145_v50  ;;  %v836_v45 = vadd.f32 %v3741_v14, %v835_v31  ;;  %v1148_v46 = vadd.f32 %v3746_v20, %v1147_v32 }
 0x19a   :  { %1798 = vst.msk [vmem:[%s4412_s8 + $0xf8] sm:$0xf] %vm1415_vm1, %v2556_v5  ;;  %v2557_v47 = vpack.c.bf16 %v844_v21, %v844_v21  ;;  %v2621_v52 = vpack.c.bf16 %v1156_v30, %v1156_v30 }
 0x19b   :  { %2119 = vst.msk [vmem:[%s4413_s9 + $0xf8] sm:$0xf] %vm2056_vm2, %v2620_v13  ;;  %2117 = vst.msk [vmem:[%s4413_s9 + $0xf0] sm:$0xf] %vm2056_vm2, %v2618_v44  ;;  %v2555_v14 = vpack.c.bf16 %v836_v45, %v836_v45  ;;  %v2619_v20 = vpack.c.bf16 %v1148_v46, %v1148_v46 }
 0x19c   :  { %1796 = vst.msk [vmem:[%s4412_s8 + $0xf0] sm:$0xf] %vm1415_vm1, %v2554_v33  ;;  %1799 = vst.msk [vmem:[%s4412_s8 + $0xfc] sm:$0xf] %vm1415_vm1, %v2557_v47 }
 0x19d   :  { %2120 = vst.msk [vmem:[%s4413_s9 + $0xfc] sm:$0xf] %vm2056_vm2, %v2621_v52  ;;  %2118 = vst.msk [vmem:[%s4413_s9 + $0xf4] sm:$0xf] %vm2056_vm2, %v2619_v20 }
 0x19e   :  { %1797 = vst.msk [vmem:[%s4412_s8 + $0xf4] sm:$0xf] %vm1415_vm1, %v2555_v14 }

</bundles_post_ra>
